<compile_context>
chip_gen: v7x
topology: tpu7x:2x2x1
jax: 0.10.0
libtpu: 0.0.40
codegen_flags: <defaults>
</compile_context>

<pallas_src>
import functools

import jax
import jax.numpy as jnp
import numpy as np
from jax.experimental import pallas as pl
from jax.experimental.pallas import tpu as pltpu


# ------------------------------------------------------------------ kernel ---
def _dencoder_kernel(x_ref, wqkv_ref, wo_ref, bo_ref, g1_ref, b1_ref,
                     g2_ref, b2_ref, w1_ref, bm1_ref, w2_ref, bm2_ref, o_ref,
                     *, batch_block, seq_len, num_heads, dim_head, scale,
                     hid_chunk, num_hid_chunks):
    Bb, T, H, Dh = batch_block, seq_len, num_heads, dim_head
    HD = H * Dh
    f32, bf16 = jnp.float32, jnp.bfloat16

    x = x_ref[...].astype(f32)                                   # (rows, D)

    # --- LayerNorm 1 (eps = 1e-5, PyTorch default) ---
    mu = jnp.mean(x, axis=-1, keepdims=True)
    var = jnp.mean(jnp.square(x - mu), axis=-1, keepdims=True)
    x1 = (x - mu) * jax.lax.rsqrt(var + 1e-5) * g1_ref[...] + b1_ref[...]

    # --- fused qkv projection: ONE bf16 matmul, f32 accumulation on the MXU ---
    qkv = jnp.dot(x1.astype(bf16), wqkv_ref[...],
                  preferred_element_type=f32)                    # (rows, 3*HD)

    # --- discriminator attention per head: cdist(q,k,p=2), scale, softmax, @v.
    # Heads stay a static python loop over Dh-wide lane slices of the fused
    # qkv output (no axis-0 concats, no per-head ctx re-slicing); Mosaic's
    # in-kernel dot_general only has a single-leading-batch-dim fast path, so
    # a (b,h)-batched 'bthd,bshd->bhts' einsum is intentionally not used.
    # TODO(synk): add flash-style KV-block tiling (online softmax) for T >~ 256.
    ctx_parts = []
    for h in range(H):
        qh = qkv[:, h * Dh:(h + 1) * Dh].reshape(Bb, T, Dh)
        kh = qkv[:, HD + h * Dh:HD + (h + 1) * Dh].reshape(Bb, T, Dh)
        vh = qkv[:, 2 * HD + h * Dh:2 * HD + (h + 1) * Dh].reshape(Bb, T, Dh)
        sq = jnp.sum(qh * qh, axis=-1, keepdims=True)            # (Bb, T, 1)
        sk = jnp.sum(kh * kh, axis=-1)[:, None, :]               # (Bb, 1, T)
        # q.k^T with f32 operands: avoids cancellation in sq + sk - 2*dots.
        dots = jnp.einsum('btd,bsd->bts', qh, kh,
                          preferred_element_type=f32)            # (Bb, T, T)
        d2 = jnp.maximum(sq + sk - 2.0 * dots, 0.0)
        a = jnp.sqrt(d2) * scale
        a = a - jnp.max(a, axis=-1, keepdims=True)
        e = jnp.exp(a)
        p = e * pl.reciprocal(jnp.sum(e, axis=-1, keepdims=True), approx=True)
        ctx = jnp.einsum('bts,bsd->btd', p.astype(bf16), vh.astype(bf16),
                         preferred_element_type=f32)             # (Bb, T, Dh)
        ctx_parts.append(ctx.reshape(Bb * T, Dh))
    # single lane concat -> '(h d)' column order expected by w_out
    res = jnp.concatenate(ctx_parts, axis=-1)                    # (rows, HD)

    attn_out = (jnp.dot(res.astype(bf16), wo_ref[...],
                        preferred_element_type=f32) + bo_ref[...])
    x = x + attn_out                             # dropout p=0.0 -> identity

    # --- LayerNorm 2 + MLP (Linear -> exact GELU -> Linear), hid chunked ---
    mu2 = jnp.mean(x, axis=-1, keepdims=True)
    var2 = jnp.mean(jnp.square(x - mu2), axis=-1, keepdims=True)
    x2 = (x - mu2) * jax.lax.rsqrt(var2 + 1e-5) * g2_ref[...] + b2_ref[...]
    x2b = x2.astype(bf16)

    inv_sqrt2 = np.float32(1.0 / np.sqrt(2.0))
    y = None
    for c in range(num_hid_chunks):
        lo = c * hid_chunk
        h1 = (jnp.dot(x2b, w1_ref[:, lo:lo + hid_chunk],
                      preferred_element_type=f32)
              + bm1_ref[:, lo:lo + hid_chunk])
        h1 = 0.5 * h1 * (1.0 + jax.lax.erf(h1 * inv_sqrt2))      # exact GELU
        part = jnp.dot(h1.astype(bf16), w2_ref[lo:lo + hid_chunk, :],
                       preferred_element_type=f32)
        y = part if y is None else y + part
    y = y + bm2_ref[...]

    o_ref[...] = (x + y).astype(o_ref.dtype)


# ------------------------------------------------------------------ helpers --
def _sigma_max(w, iters=48):
    """Largest singular value via power iteration (replaces full SVD)."""
    n = w.shape[1]
    v = jnp.ones((n,), jnp.float32) + 0.01 * jnp.arange(n, dtype=jnp.float32) / n
    v = v / jnp.linalg.norm(v)

    def body(_, v):
        u = w @ v
        u = u / (jnp.linalg.norm(u) + 1e-30)
        v = w.T @ u
        return v / (jnp.linalg.norm(v) + 1e-30)

    v = jax.lax.fori_loop(0, iters, body, v)
    return jnp.linalg.norm(w @ v)


def _spectral_rescale(w_qkv):
    # TODO(synk): torch.svd has no in-kernel Pallas equivalent; the rescale
    # runs as on-device jnp power iteration in the jitted wrapper.
    w = w_qkv.astype(jnp.float32)
    s_init = _sigma_max(w)
    s_fwd = _sigma_max(w + 1e-4)
    return w * (s_init / s_fwd)


def _vmem_capacity_bytes():
    try:
        return int(pltpu.get_tpu_info().vmem_capacity_bytes)
    except Exception:
        return 64 * 1024 * 1024       # conservative (v7x per-core VMEM)


def _pick_hid_chunk(hid):
    if hid <= 2048:
        return hid
    for c in (2048, 1536, 1024, 512, 256, 128):
        if hid % c == 0:
            return c
    return hid


def _vmem_bytes(Bb, T, D, HD, hid, hid_chunk, x_itemsize):
    """Rough per-step VMEM estimate: weights + slabs + activations + scores."""
    rows = Bb * T
    weights = 2 * (D * 3 * HD + HD * D + D * hid + hid * D)      # bf16, 1-buffered
    biases = 4 * (6 * D + hid)
    io = 2 * rows * D * (x_itemsize + 4)                         # dbl-buf x/out slabs
    act = 4 * rows * (4 * D + 8 * HD + 3 * hid_chunk)            # f32/bf16 temporaries
    scores = 16 * Bb * T * T                                     # per-head (Bb,T,T) temps
    return int(weights + biases + io + act + scores)


def _pick_batch_block(B, T, D, HD, hid, hid_chunk, x_itemsize, budget):
    """Largest VMEM-fitting batch block with grid >= 2 (both v7x TCs busy)."""
    cap = max(1, B // 2)
    best = None
    for Bb in range(1, cap + 1):
        if B % Bb:
            continue
        if (Bb * T) % 8 and Bb != B:           # (8,128) sublane constraint
            continue
        if _vmem_bytes(Bb, T, D, HD, hid, hid_chunk, x_itemsize) <= budget:
            best = Bb
    if best is None:
        for Bb in range(1, B + 1):
            if B % Bb == 0 and ((Bb * T) % 8 == 0 or Bb == B):
                best = Bb
                break
    return best if best is not None else B


# ------------------------------------------------------------------ forward --
@functools.partial(jax.jit, static_argnums=(2, 3, 4))
def _dencoder_forward(x, params, num_heads, dim_head, buffered):
    B, T, D = x.shape
    H, Dh = num_heads, dim_head
    HD = H * Dh
    hid = params["w1"].shape[0]
    f32, bf16 = jnp.float32, jnp.bfloat16

    # Forward-time spectral rescale of the qkv weight (f32, on device).
    w_qkv = _spectral_rescale(params["w_qkv"])                   # (3*HD, D)

    # Fused qkv weight, columns ordered (k, h, d): q/k/v are contiguous
    # HD-wide lane slices and each head is a Dh-wide lane slice.  Cast to
    # bf16 only AFTER the f32 rescale.
    wr = w_qkv.reshape(Dh, 3, H, D)
    wqkv = jnp.transpose(wr, (1, 2, 0, 3)).reshape(3 * HD, D).T.astype(bf16)

    wo = params["w_out"].T.astype(bf16)                          # (HD, D)
    bo = params["b_out"].reshape(1, D).astype(f32)
    g1 = params["g1"].reshape(1, D).astype(f32)
    b1 = params["b1"].reshape(1, D).astype(f32)
    g2 = params["g2"].reshape(1, D).astype(f32)
    b2 = params["b2"].reshape(1, D).astype(f32)
    w1 = params["w1"].T.astype(bf16)                             # (D, hid)
    bm1 = params["bm1"].reshape(1, hid).astype(f32)
    w2 = params["w2"].T.astype(bf16)                             # (hid, D)
    bm2 = params["bm2"].reshape(1, D).astype(f32)

    hid_chunk = _pick_hid_chunk(hid)
    cap = _vmem_capacity_bytes()
    Bb = _pick_batch_block(B, T, D, HD, hid, hid_chunk, x.dtype.itemsize,
                           budget=int(cap * 0.7))
    rows = Bb * T

    est = _vmem_bytes(Bb, T, D, HD, hid, hid_chunk, x.dtype.itemsize)
    vmem_limit = int(min(max(est * 1.4, 32 * 1024 * 1024),
                         cap * 0.9, 100 * 1024 * 1024))

    xf = x.reshape(B * T, D)     # keep source dtype; upcast to f32 in-kernel

    kernel = functools.partial(
        _dencoder_kernel, batch_block=Bb, seq_len=T, num_heads=H, dim_head=Dh,
        scale=float(D) ** (-0.5), hid_chunk=hid_chunk,
        num_hid_chunks=hid // hid_chunk)

    def const_spec(shape):
        zeros = (0,) * len(shape)
        idx = lambda i, _z=zeros: _z
        if buffered:
            # constant-index weights: single-buffered -> half the weight VMEM
            return pl.BlockSpec(shape, idx, pipeline_mode=pl.Buffered(1))
        return pl.BlockSpec(shape, idx)

    out = pl.pallas_call(
        kernel,
        out_shape=jax.ShapeDtypeStruct((B * T, D), x.dtype),
        grid_spec=pltpu.PrefetchScalarGridSpec(
            num_scalar_prefetch=0,
            grid=(B // Bb,),
            in_specs=[
                pl.BlockSpec((rows, D), lambda i: (i, 0)),       # x row slab
                const_spec((D, 3 * HD)),                         # fused qkv W
                const_spec((HD, D)), const_spec((1, D)),         # w_out, b_out
                const_spec((1, D)), const_spec((1, D)),          # ln1 g/b
                const_spec((1, D)), const_spec((1, D)),          # ln2 g/b
                const_spec((D, hid)), const_spec((1, hid)),      # mlp w1/b1
                const_spec((hid, D)), const_spec((1, D)),        # mlp w2/b2
            ],
            out_specs=pl.BlockSpec((rows, D), lambda i: (i, 0)),
        ),
        compiler_params=pltpu.CompilerParams(
            dimension_semantics=("parallel",),
            vmem_limit_bytes=vmem_limit),
    )(xf, wqkv, wo, bo, g1, b1, g2, b2, w1, bm1, w2, bm2)
    return out.reshape(B, T, D)


def dencoder_block(x, params, num_heads, dim_head):
    try:
        out = _dencoder_forward(x, params, num_heads, dim_head, True)
        return jax.block_until_ready(out)
    except Exception:
        # fallback: identical kernel without pl.Buffered(1) weight specs
        out = _dencoder_forward(x, params, num_heads, dim_head, False)
        return jax.block_until_ready(out)


# ------------------------------------------------------------- reference -----
def reference(x, params, num_heads, dim_head):
    B, T, D = x.shape
    H, Dh = num_heads, dim_head

    def ln(z, g, b):
        mu = jnp.mean(z, -1, keepdims=True)
        var = jnp.mean((z - mu) ** 2, -1, keepdims=True)
        return (z - mu) / jnp.sqrt(var + 1e-5) * g + b

    w = params["w_qkv"].astype(jnp.float32)
    s_init = jnp.max(jnp.linalg.svd(w, compute_uv=False))
    s_fwd = jnp.max(jnp.linalg.svd(w + 1e-4, compute_uv=False))
    w = w * (s_init / s_fwd)

    x1 = ln(x, params["g1"], params["b1"])
    qkv = x1 @ w.T                                               # (B,T,3*H*Dh)
    qkv = qkv.reshape(B, T, Dh, 3, H)
    qkv = jnp.transpose(qkv, (3, 0, 4, 1, 2))                    # k b h t d
    q, k, v = qkv[0], qkv[1], qkv[2]
    attn = jnp.sqrt(jnp.maximum(
        jnp.sum((q[:, :, :, None, :] - k[:, :, None, :, :]) ** 2, -1), 0.0))
    p = jax.nn.softmax(attn * (float(D) ** (-0.5)), axis=-1)
    res = jnp.einsum("bhij,bhjd->bhid", p, v)
    res = jnp.transpose(res, (0, 2, 1, 3)).reshape(B, T, H * Dh)
    attn_out = res @ params["w_out"].T + params["b_out"]
    xx = x + attn_out
    x2 = ln(xx, params["g2"], params["b2"])
    h1 = x2 @ params["w1"].T + params["bm1"]
    h1 = jax.nn.gelu(h1, approximate=False)
    y = h1 @ params["w2"].T + params["bm2"]
    return xx + y


# ----------------------------------------------------------------- main ------
if __name__ == "__main__":
    B, T, D = 2, 8, 32
    H = 4
    Dh = D // H
    hid = D * 4  # mlp_ratio = 4

    key = jax.random.PRNGKey(0)
    ks = jax.random.split(key, 8)
    params = {
        "w_qkv": 0.05 * jax.random.normal(ks[0], (3 * H * Dh, D), jnp.float32),
        "w_out": 0.05 * jax.random.normal(ks[1], (D, H * Dh), jnp.float32),
        "b_out": 0.01 * jax.random.normal(ks[2], (D,), jnp.float32),
        "g1": jnp.ones((D,), jnp.float32),
        "b1": jnp.zeros((D,), jnp.float32),
        "g2": jnp.ones((D,), jnp.float32),
        "b2": jnp.zeros((D,), jnp.float32),
        "w1": 0.05 * jax.random.normal(ks[3], (hid, D), jnp.float32),
        "bm1": 0.01 * jax.random.normal(ks[4], (hid,), jnp.float32),
        "w2": 0.05 * jax.random.normal(ks[5], (D, hid), jnp.float32),
        "bm2": 0.01 * jax.random.normal(ks[6], (D,), jnp.float32),
    }
    x = jax.random.normal(ks[7], (B, T, D), jnp.float32)

    out = dencoder_block(x, params, H, Dh)
    out = jax.block_until_ready(out)

    ref = jax.block_until_ready(reference(x, params, H, Dh))
    np.testing.assert_allclose(np.asarray(out), np.asarray(ref),
                               rtol=1e-2, atol=1e-2)
    print("KERNEL_OK")
</pallas_src>

<mosaic_0001>
module attributes {stable_mosaic.version = 11 : i64} {
  func.func @_dencoder_kernel(%arg0: i32, %arg1: memref<8x32xf32, #tpu.memory_space<vmem>>, %arg2: memref<32x96xbf16, #tpu.memory_space<vmem>>, %arg3: memref<32x32xbf16, #tpu.memory_space<vmem>>, %arg4: memref<1x32xf32, #tpu.memory_space<vmem>>, %arg5: memref<1x32xf32, #tpu.memory_space<vmem>>, %arg6: memref<1x32xf32, #tpu.memory_space<vmem>>, %arg7: memref<1x32xf32, #tpu.memory_space<vmem>>, %arg8: memref<1x32xf32, #tpu.memory_space<vmem>>, %arg9: memref<32x128xbf16, #tpu.memory_space<vmem>>, %arg10: memref<1x128xf32, #tpu.memory_space<vmem>>, %arg11: memref<128x32xbf16, #tpu.memory_space<vmem>>, %arg12: memref<1x32xf32, #tpu.memory_space<vmem>>, %arg13: memref<8x32xf32, #tpu.memory_space<vmem>>) attributes {dimension_semantics = [#tpu.dimension_semantics<parallel>], iteration_bounds = array<i64: 2>, scalar_prefetch = 0 : i64, scratch_operands = 0 : i64, tpu.core_type = #tpu.core_type<tc>, window_params = [{transform_indices = @transform_0, window_bounds = array<i64: 8, 32>}, {pipeline_mode = #tpu.pipeline_mode<synchronous>, transform_indices = @transform_1, window_bounds = array<i64: 32, 96>}, {pipeline_mode = #tpu.pipeline_mode<synchronous>, transform_indices = @transform_2, window_bounds = array<i64: 32, 32>}, {pipeline_mode = #tpu.pipeline_mode<synchronous>, transform_indices = @transform_3, window_bounds = array<i64: 1, 32>}, {pipeline_mode = #tpu.pipeline_mode<synchronous>, transform_indices = @transform_4, window_bounds = array<i64: 1, 32>}, {pipeline_mode = #tpu.pipeline_mode<synchronous>, transform_indices = @transform_5, window_bounds = array<i64: 1, 32>}, {pipeline_mode = #tpu.pipeline_mode<synchronous>, transform_indices = @transform_6, window_bounds = array<i64: 1, 32>}, {pipeline_mode = #tpu.pipeline_mode<synchronous>, transform_indices = @transform_7, window_bounds = array<i64: 1, 32>}, {pipeline_mode = #tpu.pipeline_mode<synchronous>, transform_indices = @transform_8, window_bounds = array<i64: 32, 128>}, {pipeline_mode = #tpu.pipeline_mode<synchronous>, transform_indices = @transform_9, window_bounds = array<i64: 1, 128>}, {pipeline_mode = #tpu.pipeline_mode<synchronous>, transform_indices = @transform_10, window_bounds = array<i64: 128, 32>}, {pipeline_mode = #tpu.pipeline_mode<synchronous>, transform_indices = @transform_11, window_bounds = array<i64: 1, 32>}, {transform_indices = @transform_12, window_bounds = array<i64: 8, 32>}]} {
    %c0 = arith.constant 0 : index
    %c0_0 = arith.constant 0 : index
    %0 = vector.load %arg1[%c0, %c0_0] : memref<8x32xf32, #tpu.memory_space<vmem>>, vector<8x32xf32>
    %cst = arith.constant dense<0.000000e+00> : vector<8xf32>
    %1 = vector.multi_reduction <add>, %0, %cst [1] : vector<8x32xf32> to vector<8xf32>
    %2 = vector.shape_cast %1 : vector<8xf32> to vector<8x1xf32>
    %cst_1 = arith.constant 3.200000e+01 : f32
    %3 = vector.broadcast %cst_1 : f32 to vector<8x1xf32>
    %4 = arith.divf %2, %3 : vector<8x1xf32>
    %5 = vector.broadcast %4 : vector<8x1xf32> to vector<8x32xf32>
    %6 = arith.subf %0, %5 : vector<8x32xf32>
    %7 = arith.mulf %6, %6 : vector<8x32xf32>
    %cst_2 = arith.constant dense<0.000000e+00> : vector<8xf32>
    %8 = vector.multi_reduction <add>, %7, %cst_2 [1] : vector<8x32xf32> to vector<8xf32>
    %9 = vector.shape_cast %8 : vector<8xf32> to vector<8x1xf32>
    %cst_3 = arith.constant 3.200000e+01 : f32
    %10 = vector.broadcast %cst_3 : f32 to vector<8x1xf32>
    %11 = arith.divf %9, %10 : vector<8x1xf32>
    %12 = vector.broadcast %4 : vector<8x1xf32> to vector<8x32xf32>
    %13 = arith.subf %0, %12 : vector<8x32xf32>
    %cst_4 = arith.constant 9.99999974E-6 : f32
    %14 = vector.broadcast %cst_4 : f32 to vector<8x1xf32>
    %15 = arith.addf %11, %14 : vector<8x1xf32>
    %16 = math.rsqrt %15 : vector<8x1xf32>
    %17 = vector.broadcast %16 : vector<8x1xf32> to vector<8x32xf32>
    %18 = arith.mulf %13, %17 : vector<8x32xf32>
    %c0_5 = arith.constant 0 : index
    %c0_6 = arith.constant 0 : index
    %19 = vector.load %arg5[%c0_5, %c0_6] : memref<1x32xf32, #tpu.memory_space<vmem>>, vector<1x32xf32>
    %20 = vector.broadcast %19 : vector<1x32xf32> to vector<8x32xf32>
    %21 = arith.mulf %18, %20 : vector<8x32xf32>
    %c0_7 = arith.constant 0 : index
    %c0_8 = arith.constant 0 : index
    %22 = vector.load %arg6[%c0_7, %c0_8] : memref<1x32xf32, #tpu.memory_space<vmem>>, vector<1x32xf32>
    %23 = vector.broadcast %22 : vector<1x32xf32> to vector<8x32xf32>
    %24 = arith.addf %21, %23 : vector<8x32xf32>
    %25 = arith.truncf %24 : vector<8x32xf32> to vector<8x32xbf16>
    %c0_9 = arith.constant 0 : index
    %c0_10 = arith.constant 0 : index
    %26 = vector.load %arg2[%c0_9, %c0_10] : memref<32x96xbf16, #tpu.memory_space<vmem>>, vector<32x96xbf16>
    %cst_11 = arith.constant dense<0.000000e+00> : vector<8x96xf32>
    %27 = tpu.matmul %25, %26, %cst_11 {dimension_numbers = #tpu.dot_dimension_numbers<[1], [0], [0], [1], [0, 0, 1, 1], [], []>} : vector<8x32xbf16>, vector<32x96xbf16>, vector<8x96xf32> -> vector<8x96xf32>
    %28 = vector.extract_strided_slice %27 {offsets = [0, 0], sizes = [8, 8], strides = [1, 1]} : vector<8x96xf32> to vector<8x8xf32>
    %29 = vector.shape_cast %28 : vector<8x8xf32> to vector<1x8x8xf32>
    %30 = vector.extract_strided_slice %27 {offsets = [0, 32], sizes = [8, 8], strides = [1, 1]} : vector<8x96xf32> to vector<8x8xf32>
    %31 = vector.shape_cast %30 : vector<8x8xf32> to vector<1x8x8xf32>
    %32 = vector.extract_strided_slice %27 {offsets = [0, 64], sizes = [8, 8], strides = [1, 1]} : vector<8x96xf32> to vector<8x8xf32>
    %33 = vector.shape_cast %32 : vector<8x8xf32> to vector<1x8x8xf32>
    %34 = arith.mulf %29, %29 : vector<1x8x8xf32>
    %cst_12 = arith.constant dense<0.000000e+00> : vector<1x8xf32>
    %35 = vector.multi_reduction <add>, %34, %cst_12 [2] : vector<1x8x8xf32> to vector<1x8xf32>
    %36 = vector.shape_cast %35 : vector<1x8xf32> to vector<1x8x1xf32>
    %37 = arith.mulf %31, %31 : vector<1x8x8xf32>
    %cst_13 = arith.constant dense<0.000000e+00> : vector<1x8xf32>
    %38 = vector.multi_reduction <add>, %37, %cst_13 [2] : vector<1x8x8xf32> to vector<1x8xf32>
    %39 = vector.shape_cast %38 : vector<1x8xf32> to vector<1x1x8xf32>
    "tpu.trace_start"() <{level = 10 : i32, message = "btd,bsd->bts"}> : () -> ()
    %cst_14 = arith.constant dense<0.000000e+00> : vector<1x8x8xf32>
    %40 = tpu.matmul %29, %31, %cst_14 {dimension_numbers = #tpu.dot_dimension_numbers<[2], [2], [1], [1], [0, 0, 0, 1, 1, 1], [0], [0]>} : vector<1x8x8xf32>, vector<1x8x8xf32>, vector<1x8x8xf32> -> vector<1x8x8xf32>
    "tpu.trace_stop"() : () -> ()
    %41 = vector.broadcast %36 : vector<1x8x1xf32> to vector<1x8x8xf32>
    %42 = vector.broadcast %39 : vector<1x1x8xf32> to vector<1x8x8xf32>
    %43 = arith.addf %41, %42 : vector<1x8x8xf32>
    %cst_15 = arith.constant 2.000000e+00 : f32
    %44 = vector.broadcast %cst_15 : f32 to vector<1x8x8xf32>
    %45 = arith.mulf %44, %40 : vector<1x8x8xf32>
    %46 = arith.subf %43, %45 : vector<1x8x8xf32>
    %cst_16 = arith.constant 0.000000e+00 : f32
    %47 = vector.broadcast %cst_16 : f32 to vector<1x8x8xf32>
    %48 = arith.maximumf %46, %47 : vector<1x8x8xf32>
    %49 = math.sqrt %48 : vector<1x8x8xf32>
    %cst_17 = arith.constant 0.176776692 : f32
    %50 = vector.broadcast %cst_17 : f32 to vector<1x8x8xf32>
    %51 = arith.mulf %49, %50 : vector<1x8x8xf32>
    %cst_18 = arith.constant dense<0xFF800000> : vector<1x8xf32>
    %52 = vector.multi_reduction <maximumf>, %51, %cst_18 [2] : vector<1x8x8xf32> to vector<1x8xf32>
    %53 = vector.shape_cast %52 : vector<1x8xf32> to vector<1x8x1xf32>
    %54 = vector.broadcast %53 : vector<1x8x1xf32> to vector<1x8x8xf32>
    %55 = arith.subf %51, %54 : vector<1x8x8xf32>
    %56 = math.exp %55 : vector<1x8x8xf32>
    %cst_19 = arith.constant dense<0.000000e+00> : vector<1x8xf32>
    %57 = vector.multi_reduction <add>, %56, %cst_19 [2] : vector<1x8x8xf32> to vector<1x8xf32>
    %58 = vector.shape_cast %57 : vector<1x8xf32> to vector<1x8x1xf32>
    %59 = tpu.reciprocal %58 {approx = true} : vector<1x8x1xf32> -> vector<1x8x1xf32>
    %60 = vector.broadcast %59 : vector<1x8x1xf32> to vector<1x8x8xf32>
    %61 = arith.mulf %56, %60 : vector<1x8x8xf32>
    %62 = arith.truncf %61 : vector<1x8x8xf32> to vector<1x8x8xbf16>
    %63 = arith.truncf %33 : vector<1x8x8xf32> to vector<1x8x8xbf16>
    "tpu.trace_start"() <{level = 10 : i32, message = "bts,bsd->btd"}> : () -> ()
    %cst_20 = arith.constant dense<0.000000e+00> : vector<1x8x8xf32>
    %64 = tpu.matmul %62, %63, %cst_20 {dimension_numbers = #tpu.dot_dimension_numbers<[2], [1], [1], [2], [0, 0, 0, 1, 1, 2], [0], [0]>} : vector<1x8x8xbf16>, vector<1x8x8xbf16>, vector<1x8x8xf32> -> vector<1x8x8xf32>
    "tpu.trace_stop"() : () -> ()
    %65 = vector.shape_cast %64 : vector<1x8x8xf32> to vector<8x8xf32>
    %66 = vector.extract_strided_slice %27 {offsets = [0, 8], sizes = [8, 8], strides = [1, 1]} : vector<8x96xf32> to vector<8x8xf32>
    %67 = vector.shape_cast %66 : vector<8x8xf32> to vector<1x8x8xf32>
    %68 = vector.extract_strided_slice %27 {offsets = [0, 40], sizes = [8, 8], strides = [1, 1]} : vector<8x96xf32> to vector<8x8xf32>
    %69 = vector.shape_cast %68 : vector<8x8xf32> to vector<1x8x8xf32>
    %70 = vector.extract_strided_slice %27 {offsets = [0, 72], sizes = [8, 8], strides = [1, 1]} : vector<8x96xf32> to vector<8x8xf32>
    %71 = vector.shape_cast %70 : vector<8x8xf32> to vector<1x8x8xf32>
    %72 = arith.mulf %67, %67 : vector<1x8x8xf32>
    %cst_21 = arith.constant dense<0.000000e+00> : vector<1x8xf32>
    %73 = vector.multi_reduction <add>, %72, %cst_21 [2] : vector<1x8x8xf32> to vector<1x8xf32>
    %74 = vector.shape_cast %73 : vector<1x8xf32> to vector<1x8x1xf32>
    %75 = arith.mulf %69, %69 : vector<1x8x8xf32>
    %cst_22 = arith.constant dense<0.000000e+00> : vector<1x8xf32>
    %76 = vector.multi_reduction <add>, %75, %cst_22 [2] : vector<1x8x8xf32> to vector<1x8xf32>
    %77 = vector.shape_cast %76 : vector<1x8xf32> to vector<1x1x8xf32>
    "tpu.trace_start"() <{level = 10 : i32, message = "btd,bsd->bts"}> : () -> ()
    %cst_23 = arith.constant dense<0.000000e+00> : vector<1x8x8xf32>
    %78 = tpu.matmul %67, %69, %cst_23 {dimension_numbers = #tpu.dot_dimension_numbers<[2], [2], [1], [1], [0, 0, 0, 1, 1, 1], [0], [0]>} : vector<1x8x8xf32>, vector<1x8x8xf32>, vector<1x8x8xf32> -> vector<1x8x8xf32>
    "tpu.trace_stop"() : () -> ()
    %79 = vector.broadcast %74 : vector<1x8x1xf32> to vector<1x8x8xf32>
    %80 = vector.broadcast %77 : vector<1x1x8xf32> to vector<1x8x8xf32>
    %81 = arith.addf %79, %80 : vector<1x8x8xf32>
    %cst_24 = arith.constant 2.000000e+00 : f32
    %82 = vector.broadcast %cst_24 : f32 to vector<1x8x8xf32>
    %83 = arith.mulf %82, %78 : vector<1x8x8xf32>
    %84 = arith.subf %81, %83 : vector<1x8x8xf32>
    %cst_25 = arith.constant 0.000000e+00 : f32
    %85 = vector.broadcast %cst_25 : f32 to vector<1x8x8xf32>
    %86 = arith.maximumf %84, %85 : vector<1x8x8xf32>
    %87 = math.sqrt %86 : vector<1x8x8xf32>
    %cst_26 = arith.constant 0.176776692 : f32
    %88 = vector.broadcast %cst_26 : f32 to vector<1x8x8xf32>
    %89 = arith.mulf %87, %88 : vector<1x8x8xf32>
    %cst_27 = arith.constant dense<0xFF800000> : vector<1x8xf32>
    %90 = vector.multi_reduction <maximumf>, %89, %cst_27 [2] : vector<1x8x8xf32> to vector<1x8xf32>
    %91 = vector.shape_cast %90 : vector<1x8xf32> to vector<1x8x1xf32>
    %92 = vector.broadcast %91 : vector<1x8x1xf32> to vector<1x8x8xf32>
    %93 = arith.subf %89, %92 : vector<1x8x8xf32>
    %94 = math.exp %93 : vector<1x8x8xf32>
    %cst_28 = arith.constant dense<0.000000e+00> : vector<1x8xf32>
    %95 = vector.multi_reduction <add>, %94, %cst_28 [2] : vector<1x8x8xf32> to vector<1x8xf32>
    %96 = vector.shape_cast %95 : vector<1x8xf32> to vector<1x8x1xf32>
    %97 = tpu.reciprocal %96 {approx = true} : vector<1x8x1xf32> -> vector<1x8x1xf32>
    %98 = vector.broadcast %97 : vector<1x8x1xf32> to vector<1x8x8xf32>
    %99 = arith.mulf %94, %98 : vector<1x8x8xf32>
    %100 = arith.truncf %99 : vector<1x8x8xf32> to vector<1x8x8xbf16>
    %101 = arith.truncf %71 : vector<1x8x8xf32> to vector<1x8x8xbf16>
    "tpu.trace_start"() <{level = 10 : i32, message = "bts,bsd->btd"}> : () -> ()
    %cst_29 = arith.constant dense<0.000000e+00> : vector<1x8x8xf32>
    %102 = tpu.matmul %100, %101, %cst_29 {dimension_numbers = #tpu.dot_dimension_numbers<[2], [1], [1], [2], [0, 0, 0, 1, 1, 2], [0], [0]>} : vector<1x8x8xbf16>, vector<1x8x8xbf16>, vector<1x8x8xf32> -> vector<1x8x8xf32>
    "tpu.trace_stop"() : () -> ()
    %103 = vector.shape_cast %102 : vector<1x8x8xf32> to vector<8x8xf32>
    %104 = vector.extract_strided_slice %27 {offsets = [0, 16], sizes = [8, 8], strides = [1, 1]} : vector<8x96xf32> to vector<8x8xf32>
    %105 = vector.shape_cast %104 : vector<8x8xf32> to vector<1x8x8xf32>
    %106 = vector.extract_strided_slice %27 {offsets = [0, 48], sizes = [8, 8], strides = [1, 1]} : vector<8x96xf32> to vector<8x8xf32>
    %107 = vector.shape_cast %106 : vector<8x8xf32> to vector<1x8x8xf32>
    %108 = vector.extract_strided_slice %27 {offsets = [0, 80], sizes = [8, 8], strides = [1, 1]} : vector<8x96xf32> to vector<8x8xf32>
    %109 = vector.shape_cast %108 : vector<8x8xf32> to vector<1x8x8xf32>
    %110 = arith.mulf %105, %105 : vector<1x8x8xf32>
    %cst_30 = arith.constant dense<0.000000e+00> : vector<1x8xf32>
    %111 = vector.multi_reduction <add>, %110, %cst_30 [2] : vector<1x8x8xf32> to vector<1x8xf32>
    %112 = vector.shape_cast %111 : vector<1x8xf32> to vector<1x8x1xf32>
    %113 = arith.mulf %107, %107 : vector<1x8x8xf32>
    %cst_31 = arith.constant dense<0.000000e+00> : vector<1x8xf32>
    %114 = vector.multi_reduction <add>, %113, %cst_31 [2] : vector<1x8x8xf32> to vector<1x8xf32>
    %115 = vector.shape_cast %114 : vector<1x8xf32> to vector<1x1x8xf32>
    "tpu.trace_start"() <{level = 10 : i32, message = "btd,bsd->bts"}> : () -> ()
    %cst_32 = arith.constant dense<0.000000e+00> : vector<1x8x8xf32>
    %116 = tpu.matmul %105, %107, %cst_32 {dimension_numbers = #tpu.dot_dimension_numbers<[2], [2], [1], [1], [0, 0, 0, 1, 1, 1], [0], [0]>} : vector<1x8x8xf32>, vector<1x8x8xf32>, vector<1x8x8xf32> -> vector<1x8x8xf32>
    "tpu.trace_stop"() : () -> ()
    %117 = vector.broadcast %112 : vector<1x8x1xf32> to vector<1x8x8xf32>
    %118 = vector.broadcast %115 : vector<1x1x8xf32> to vector<1x8x8xf32>
    %119 = arith.addf %117, %118 : vector<1x8x8xf32>
    %cst_33 = arith.constant 2.000000e+00 : f32
    %120 = vector.broadcast %cst_33 : f32 to vector<1x8x8xf32>
    %121 = arith.mulf %120, %116 : vector<1x8x8xf32>
    %122 = arith.subf %119, %121 : vector<1x8x8xf32>
    %cst_34 = arith.constant 0.000000e+00 : f32
    %123 = vector.broadcast %cst_34 : f32 to vector<1x8x8xf32>
    %124 = arith.maximumf %122, %123 : vector<1x8x8xf32>
    %125 = math.sqrt %124 : vector<1x8x8xf32>
    %cst_35 = arith.constant 0.176776692 : f32
    %126 = vector.broadcast %cst_35 : f32 to vector<1x8x8xf32>
    %127 = arith.mulf %125, %126 : vector<1x8x8xf32>
    %cst_36 = arith.constant dense<0xFF800000> : vector<1x8xf32>
    %128 = vector.multi_reduction <maximumf>, %127, %cst_36 [2] : vector<1x8x8xf32> to vector<1x8xf32>
    %129 = vector.shape_cast %128 : vector<1x8xf32> to vector<1x8x1xf32>
    %130 = vector.broadcast %129 : vector<1x8x1xf32> to vector<1x8x8xf32>
    %131 = arith.subf %127, %130 : vector<1x8x8xf32>
    %132 = math.exp %131 : vector<1x8x8xf32>
    %cst_37 = arith.constant dense<0.000000e+00> : vector<1x8xf32>
    %133 = vector.multi_reduction <add>, %132, %cst_37 [2] : vector<1x8x8xf32> to vector<1x8xf32>
    %134 = vector.shape_cast %133 : vector<1x8xf32> to vector<1x8x1xf32>
    %135 = tpu.reciprocal %134 {approx = true} : vector<1x8x1xf32> -> vector<1x8x1xf32>
    %136 = vector.broadcast %135 : vector<1x8x1xf32> to vector<1x8x8xf32>
    %137 = arith.mulf %132, %136 : vector<1x8x8xf32>
    %138 = arith.truncf %137 : vector<1x8x8xf32> to vector<1x8x8xbf16>
    %139 = arith.truncf %109 : vector<1x8x8xf32> to vector<1x8x8xbf16>
    "tpu.trace_start"() <{level = 10 : i32, message = "bts,bsd->btd"}> : () -> ()
    %cst_38 = arith.constant dense<0.000000e+00> : vector<1x8x8xf32>
    %140 = tpu.matmul %138, %139, %cst_38 {dimension_numbers = #tpu.dot_dimension_numbers<[2], [1], [1], [2], [0, 0, 0, 1, 1, 2], [0], [0]>} : vector<1x8x8xbf16>, vector<1x8x8xbf16>, vector<1x8x8xf32> -> vector<1x8x8xf32>
    "tpu.trace_stop"() : () -> ()
    %141 = vector.shape_cast %140 : vector<1x8x8xf32> to vector<8x8xf32>
    %142 = vector.extract_strided_slice %27 {offsets = [0, 24], sizes = [8, 8], strides = [1, 1]} : vector<8x96xf32> to vector<8x8xf32>
    %143 = vector.shape_cast %142 : vector<8x8xf32> to vector<1x8x8xf32>
    %144 = vector.extract_strided_slice %27 {offsets = [0, 56], sizes = [8, 8], strides = [1, 1]} : vector<8x96xf32> to vector<8x8xf32>
    %145 = vector.shape_cast %144 : vector<8x8xf32> to vector<1x8x8xf32>
    %146 = vector.extract_strided_slice %27 {offsets = [0, 88], sizes = [8, 8], strides = [1, 1]} : vector<8x96xf32> to vector<8x8xf32>
    %147 = vector.shape_cast %146 : vector<8x8xf32> to vector<1x8x8xf32>
    %148 = arith.mulf %143, %143 : vector<1x8x8xf32>
    %cst_39 = arith.constant dense<0.000000e+00> : vector<1x8xf32>
    %149 = vector.multi_reduction <add>, %148, %cst_39 [2] : vector<1x8x8xf32> to vector<1x8xf32>
    %150 = vector.shape_cast %149 : vector<1x8xf32> to vector<1x8x1xf32>
    %151 = arith.mulf %145, %145 : vector<1x8x8xf32>
    %cst_40 = arith.constant dense<0.000000e+00> : vector<1x8xf32>
    %152 = vector.multi_reduction <add>, %151, %cst_40 [2] : vector<1x8x8xf32> to vector<1x8xf32>
    %153 = vector.shape_cast %152 : vector<1x8xf32> to vector<1x1x8xf32>
    "tpu.trace_start"() <{level = 10 : i32, message = "btd,bsd->bts"}> : () -> ()
    %cst_41 = arith.constant dense<0.000000e+00> : vector<1x8x8xf32>
    %154 = tpu.matmul %143, %145, %cst_41 {dimension_numbers = #tpu.dot_dimension_numbers<[2], [2], [1], [1], [0, 0, 0, 1, 1, 1], [0], [0]>} : vector<1x8x8xf32>, vector<1x8x8xf32>, vector<1x8x8xf32> -> vector<1x8x8xf32>
    "tpu.trace_stop"() : () -> ()
    %155 = vector.broadcast %150 : vector<1x8x1xf32> to vector<1x8x8xf32>
    %156 = vector.broadcast %153 : vector<1x1x8xf32> to vector<1x8x8xf32>
    %157 = arith.addf %155, %156 : vector<1x8x8xf32>
    %cst_42 = arith.constant 2.000000e+00 : f32
    %158 = vector.broadcast %cst_42 : f32 to vector<1x8x8xf32>
    %159 = arith.mulf %158, %154 : vector<1x8x8xf32>
    %160 = arith.subf %157, %159 : vector<1x8x8xf32>
    %cst_43 = arith.constant 0.000000e+00 : f32
    %161 = vector.broadcast %cst_43 : f32 to vector<1x8x8xf32>
    %162 = arith.maximumf %160, %161 : vector<1x8x8xf32>
    %163 = math.sqrt %162 : vector<1x8x8xf32>
    %cst_44 = arith.constant 0.176776692 : f32
    %164 = vector.broadcast %cst_44 : f32 to vector<1x8x8xf32>
    %165 = arith.mulf %163, %164 : vector<1x8x8xf32>
    %cst_45 = arith.constant dense<0xFF800000> : vector<1x8xf32>
    %166 = vector.multi_reduction <maximumf>, %165, %cst_45 [2] : vector<1x8x8xf32> to vector<1x8xf32>
    %167 = vector.shape_cast %166 : vector<1x8xf32> to vector<1x8x1xf32>
    %168 = vector.broadcast %167 : vector<1x8x1xf32> to vector<1x8x8xf32>
    %169 = arith.subf %165, %168 : vector<1x8x8xf32>
    %170 = math.exp %169 : vector<1x8x8xf32>
    %cst_46 = arith.constant dense<0.000000e+00> : vector<1x8xf32>
    %171 = vector.multi_reduction <add>, %170, %cst_46 [2] : vector<1x8x8xf32> to vector<1x8xf32>
    %172 = vector.shape_cast %171 : vector<1x8xf32> to vector<1x8x1xf32>
    %173 = tpu.reciprocal %172 {approx = true} : vector<1x8x1xf32> -> vector<1x8x1xf32>
    %174 = vector.broadcast %173 : vector<1x8x1xf32> to vector<1x8x8xf32>
    %175 = arith.mulf %170, %174 : vector<1x8x8xf32>
    %176 = arith.truncf %175 : vector<1x8x8xf32> to vector<1x8x8xbf16>
    %177 = arith.truncf %147 : vector<1x8x8xf32> to vector<1x8x8xbf16>
    "tpu.trace_start"() <{level = 10 : i32, message = "bts,bsd->btd"}> : () -> ()
    %cst_47 = arith.constant dense<0.000000e+00> : vector<1x8x8xf32>
    %178 = tpu.matmul %176, %177, %cst_47 {dimension_numbers = #tpu.dot_dimension_numbers<[2], [1], [1], [2], [0, 0, 0, 1, 1, 2], [0], [0]>} : vector<1x8x8xbf16>, vector<1x8x8xbf16>, vector<1x8x8xf32> -> vector<1x8x8xf32>
    "tpu.trace_stop"() : () -> ()
    %179 = vector.shape_cast %178 : vector<1x8x8xf32> to vector<8x8xf32>
    %180 = tpu.concatenate %65, %103, %141, %179 in 1 : vector<8x8xf32>, vector<8x8xf32>, vector<8x8xf32>, vector<8x8xf32> -> vector<8x32xf32>
    %181 = arith.truncf %180 : vector<8x32xf32> to vector<8x32xbf16>
    %c0_48 = arith.constant 0 : index
    %c0_49 = arith.constant 0 : index
    %182 = vector.load %arg3[%c0_48, %c0_49] : memref<32x32xbf16, #tpu.memory_space<vmem>>, vector<32x32xbf16>
    %cst_50 = arith.constant dense<0.000000e+00> : vector<8x32xf32>
    %183 = tpu.matmul %181, %182, %cst_50 {dimension_numbers = #tpu.dot_dimension_numbers<[1], [0], [0], [1], [0, 0, 1, 1], [], []>} : vector<8x32xbf16>, vector<32x32xbf16>, vector<8x32xf32> -> vector<8x32xf32>
    %c0_51 = arith.constant 0 : index
    %c0_52 = arith.constant 0 : index
    %184 = vector.load %arg4[%c0_51, %c0_52] : memref<1x32xf32, #tpu.memory_space<vmem>>, vector<1x32xf32>
    %185 = vector.broadcast %184 : vector<1x32xf32> to vector<8x32xf32>
    %186 = arith.addf %183, %185 : vector<8x32xf32>
    %187 = arith.addf %0, %186 : vector<8x32xf32>
    %cst_53 = arith.constant dense<0.000000e+00> : vector<8xf32>
    %188 = vector.multi_reduction <add>, %187, %cst_53 [1] : vector<8x32xf32> to vector<8xf32>
    %189 = vector.shape_cast %188 : vector<8xf32> to vector<8x1xf32>
    %cst_54 = arith.constant 3.200000e+01 : f32
    %190 = vector.broadcast %cst_54 : f32 to vector<8x1xf32>
    %191 = arith.divf %189, %190 : vector<8x1xf32>
    %192 = vector.broadcast %191 : vector<8x1xf32> to vector<8x32xf32>
    %193 = arith.subf %187, %192 : vector<8x32xf32>
    %194 = arith.mulf %193, %193 : vector<8x32xf32>
    %cst_55 = arith.constant dense<0.000000e+00> : vector<8xf32>
    %195 = vector.multi_reduction <add>, %194, %cst_55 [1] : vector<8x32xf32> to vector<8xf32>
    %196 = vector.shape_cast %195 : vector<8xf32> to vector<8x1xf32>
    %cst_56 = arith.constant 3.200000e+01 : f32
    %197 = vector.broadcast %cst_56 : f32 to vector<8x1xf32>
    %198 = arith.divf %196, %197 : vector<8x1xf32>
    %199 = vector.broadcast %191 : vector<8x1xf32> to vector<8x32xf32>
    %200 = arith.subf %187, %199 : vector<8x32xf32>
    %cst_57 = arith.constant 9.99999974E-6 : f32
    %201 = vector.broadcast %cst_57 : f32 to vector<8x1xf32>
    %202 = arith.addf %198, %201 : vector<8x1xf32>
    %203 = math.rsqrt %202 : vector<8x1xf32>
    %204 = vector.broadcast %203 : vector<8x1xf32> to vector<8x32xf32>
    %205 = arith.mulf %200, %204 : vector<8x32xf32>
    %c0_58 = arith.constant 0 : index
    %c0_59 = arith.constant 0 : index
    %206 = vector.load %arg7[%c0_58, %c0_59] : memref<1x32xf32, #tpu.memory_space<vmem>>, vector<1x32xf32>
    %207 = vector.broadcast %206 : vector<1x32xf32> to vector<8x32xf32>
    %208 = arith.mulf %205, %207 : vector<8x32xf32>
    %c0_60 = arith.constant 0 : index
    %c0_61 = arith.constant 0 : index
    %209 = vector.load %arg8[%c0_60, %c0_61] : memref<1x32xf32, #tpu.memory_space<vmem>>, vector<1x32xf32>
    %210 = vector.broadcast %209 : vector<1x32xf32> to vector<8x32xf32>
    %211 = arith.addf %208, %210 : vector<8x32xf32>
    %212 = arith.truncf %211 : vector<8x32xf32> to vector<8x32xbf16>
    %c0_62 = arith.constant 0 : index
    %c0_63 = arith.constant 0 : index
    %213 = vector.load %arg9[%c0_62, %c0_63] : memref<32x128xbf16, #tpu.memory_space<vmem>>, vector<32x128xbf16>
    %cst_64 = arith.constant dense<0.000000e+00> : vector<8x128xf32>
    %214 = tpu.matmul %212, %213, %cst_64 {dimension_numbers = #tpu.dot_dimension_numbers<[1], [0], [0], [1], [0, 0, 1, 1], [], []>} : vector<8x32xbf16>, vector<32x128xbf16>, vector<8x128xf32> -> vector<8x128xf32>
    %c0_65 = arith.constant 0 : index
    %c0_66 = arith.constant 0 : index
    %215 = vector.load %arg10[%c0_65, %c0_66] : memref<1x128xf32, #tpu.memory_space<vmem>>, vector<1x128xf32>
    %216 = vector.broadcast %215 : vector<1x128xf32> to vector<8x128xf32>
    %217 = arith.addf %214, %216 : vector<8x128xf32>
    %cst_67 = arith.constant 5.000000e-01 : f32
    %218 = vector.broadcast %cst_67 : f32 to vector<8x128xf32>
    %219 = arith.mulf %218, %217 : vector<8x128xf32>
    %cst_68 = arith.constant 0.707106769 : f32
    %220 = vector.broadcast %cst_68 : f32 to vector<8x128xf32>
    %221 = arith.mulf %217, %220 : vector<8x128xf32>
    %222 = math.erf %221 : vector<8x128xf32>
    %cst_69 = arith.constant 1.000000e+00 : f32
    %223 = vector.broadcast %cst_69 : f32 to vector<8x128xf32>
    %224 = arith.addf %223, %222 : vector<8x128xf32>
    %225 = arith.mulf %219, %224 : vector<8x128xf32>
    %226 = arith.truncf %225 : vector<8x128xf32> to vector<8x128xbf16>
    %c0_70 = arith.constant 0 : index
    %c0_71 = arith.constant 0 : index
    %227 = vector.load %arg11[%c0_70, %c0_71] : memref<128x32xbf16, #tpu.memory_space<vmem>>, vector<128x32xbf16>
    %cst_72 = arith.constant dense<0.000000e+00> : vector<8x32xf32>
    %228 = tpu.matmul %226, %227, %cst_72 {dimension_numbers = #tpu.dot_dimension_numbers<[1], [0], [0], [1], [0, 0, 1, 1], [], []>} : vector<8x128xbf16>, vector<128x32xbf16>, vector<8x32xf32> -> vector<8x32xf32>
    %c0_73 = arith.constant 0 : index
    %c0_74 = arith.constant 0 : index
    %229 = vector.load %arg12[%c0_73, %c0_74] : memref<1x32xf32, #tpu.memory_space<vmem>>, vector<1x32xf32>
    %230 = vector.broadcast %229 : vector<1x32xf32> to vector<8x32xf32>
    %231 = arith.addf %228, %230 : vector<8x32xf32>
    %232 = arith.addf %187, %231 : vector<8x32xf32>
    %c0_75 = arith.constant 0 : index
    %c0_76 = arith.constant 0 : index
    %233 = vector.load %arg13[%c0_75, %c0_76] : memref<8x32xf32, #tpu.memory_space<vmem>>, vector<8x32xf32>
    tpu.vector_store %arg13[%c0_75, %c0_76], %232 {strides = array<i32>} : memref<8x32xf32, #tpu.memory_space<vmem>>, vector<8x32xf32>,
    return
  }
  func.func @transform_0(%arg0: i32) -> (i32, i32) {
    %c0_i32 = arith.constant 0 : i32
    %c0_i32_0 = arith.constant 0 : i32
    return %arg0, %c0_i32 : i32, i32
  }
  func.func @transform_1(%arg0: i32) -> (i32, i32) {
    %c0_i32 = arith.constant 0 : i32
    %c0_i32_0 = arith.constant 0 : i32
    %c0_i32_1 = arith.constant 0 : i32
    return %c0_i32, %c0_i32_0 : i32, i32
  }
  func.func @transform_2(%arg0: i32) -> (i32, i32) {
    %c0_i32 = arith.constant 0 : i32
    %c0_i32_0 = arith.constant 0 : i32
    %c0_i32_1 = arith.constant 0 : i32
    return %c0_i32, %c0_i32_0 : i32, i32
  }
  func.func @transform_3(%arg0: i32) -> (i32, i32) {
    %c0_i32 = arith.constant 0 : i32
    %c0_i32_0 = arith.constant 0 : i32
    %c0_i32_1 = arith.constant 0 : i32
    return %c0_i32, %c0_i32_0 : i32, i32
  }
  func.func @transform_4(%arg0: i32) -> (i32, i32) {
    %c0_i32 = arith.constant 0 : i32
    %c0_i32_0 = arith.constant 0 : i32
    %c0_i32_1 = arith.constant 0 : i32
    return %c0_i32, %c0_i32_0 : i32, i32
  }
  func.func @transform_5(%arg0: i32) -> (i32, i32) {
    %c0_i32 = arith.constant 0 : i32
    %c0_i32_0 = arith.constant 0 : i32
    %c0_i32_1 = arith.constant 0 : i32
    return %c0_i32, %c0_i32_0 : i32, i32
  }
  func.func @transform_6(%arg0: i32) -> (i32, i32) {
    %c0_i32 = arith.constant 0 : i32
    %c0_i32_0 = arith.constant 0 : i32
    %c0_i32_1 = arith.constant 0 : i32
    return %c0_i32, %c0_i32_0 : i32, i32
  }
  func.func @transform_7(%arg0: i32) -> (i32, i32) {
    %c0_i32 = arith.constant 0 : i32
    %c0_i32_0 = arith.constant 0 : i32
    %c0_i32_1 = arith.constant 0 : i32
    return %c0_i32, %c0_i32_0 : i32, i32
  }
  func.func @transform_8(%arg0: i32) -> (i32, i32) {
    %c0_i32 = arith.constant 0 : i32
    %c0_i32_0 = arith.constant 0 : i32
    %c0_i32_1 = arith.constant 0 : i32
    return %c0_i32, %c0_i32_0 : i32, i32
  }
  func.func @transform_9(%arg0: i32) -> (i32, i32) {
    %c0_i32 = arith.constant 0 : i32
    %c0_i32_0 = arith.constant 0 : i32
    %c0_i32_1 = arith.constant 0 : i32
    return %c0_i32, %c0_i32_0 : i32, i32
  }
  func.func @transform_10(%arg0: i32) -> (i32, i32) {
    %c0_i32 = arith.constant 0 : i32
    %c0_i32_0 = arith.constant 0 : i32
    %c0_i32_1 = arith.constant 0 : i32
    return %c0_i32, %c0_i32_0 : i32, i32
  }
  func.func @transform_11(%arg0: i32) -> (i32, i32) {
    %c0_i32 = arith.constant 0 : i32
    %c0_i32_0 = arith.constant 0 : i32
    %c0_i32_1 = arith.constant 0 : i32
    return %c0_i32, %c0_i32_0 : i32, i32
  }
  func.func @transform_12(%arg0: i32) -> (i32, i32) {
    %c0_i32 = arith.constant 0 : i32
    %c0_i32_0 = arith.constant 0 : i32
    return %arg0, %c0_i32 : i32, i32
  }
}

module attributes {stable_mosaic.version = 11 : i64} {
  func.func @_dencoder_kernel(%arg0: i32, %arg1: memref<8x32xf32, #tpu.memory_space<vmem>>, %arg2: memref<32x96xbf16, #tpu.memory_space<vmem>>, %arg3: memref<32x32xbf16, #tpu.memory_space<vmem>>, %arg4: memref<1x32xf32, #tpu.memory_space<vmem>>, %arg5: memref<1x32xf32, #tpu.memory_space<vmem>>, %arg6: memref<1x32xf32, #tpu.memory_space<vmem>>, %arg7: memref<1x32xf32, #tpu.memory_space<vmem>>, %arg8: memref<1x32xf32, #tpu.memory_space<vmem>>, %arg9: memref<32x128xbf16, #tpu.memory_space<vmem>>, %arg10: memref<1x128xf32, #tpu.memory_space<vmem>>, %arg11: memref<128x32xbf16, #tpu.memory_space<vmem>>, %arg12: memref<1x32xf32, #tpu.memory_space<vmem>>, %arg13: memref<8x32xf32, #tpu.memory_space<vmem>>) attributes {dimension_semantics = [#tpu.dimension_semantics<parallel>], iteration_bounds = array<i64: 2>, scalar_prefetch = 0 : i64, scratch_operands = 0 : i64, tpu.core_type = #tpu.core_type<tc>, window_params = [{transform_indices = @transform_0, window_bounds = array<i64: 8, 32>}, {pipeline_mode = #tpu.pipeline_mode<synchronous>, transform_indices = @transform_1, window_bounds = array<i64: 32, 96>}, {pipeline_mode = #tpu.pipeline_mode<synchronous>, transform_indices = @transform_2, window_bounds = array<i64: 32, 32>}, {pipeline_mode = #tpu.pipeline_mode<synchronous>, transform_indices = @transform_3, window_bounds = array<i64: 1, 32>}, {pipeline_mode = #tpu.pipeline_mode<synchronous>, transform_indices = @transform_4, window_bounds = array<i64: 1, 32>}, {pipeline_mode = #tpu.pipeline_mode<synchronous>, transform_indices = @transform_5, window_bounds = array<i64: 1, 32>}, {pipeline_mode = #tpu.pipeline_mode<synchronous>, transform_indices = @transform_6, window_bounds = array<i64: 1, 32>}, {pipeline_mode = #tpu.pipeline_mode<synchronous>, transform_indices = @transform_7, window_bounds = array<i64: 1, 32>}, {pipeline_mode = #tpu.pipeline_mode<synchronous>, transform_indices = @transform_8, window_bounds = array<i64: 32, 128>}, {pipeline_mode = #tpu.pipeline_mode<synchronous>, transform_indices = @transform_9, window_bounds = array<i64: 1, 128>}, {pipeline_mode = #tpu.pipeline_mode<synchronous>, transform_indices = @transform_10, window_bounds = array<i64: 128, 32>}, {pipeline_mode = #tpu.pipeline_mode<synchronous>, transform_indices = @transform_11, window_bounds = array<i64: 1, 32>}, {transform_indices = @transform_12, window_bounds = array<i64: 8, 32>}]} {
    %c0 = arith.constant 0 : index
    %c0_0 = arith.constant 0 : index
    %0 = vector.load %arg1[%c0, %c0_0] : memref<8x32xf32, #tpu.memory_space<vmem>>, vector<8x32xf32>
    %cst = arith.constant dense<0.000000e+00> : vector<8xf32>
    %1 = vector.multi_reduction <add>, %0, %cst [1] : vector<8x32xf32> to vector<8xf32>
    %2 = vector.shape_cast %1 : vector<8xf32> to vector<8x1xf32>
    %cst_1 = arith.constant 3.200000e+01 : f32
    %3 = vector.broadcast %cst_1 : f32 to vector<8x1xf32>
    %4 = arith.divf %2, %3 : vector<8x1xf32>
    %5 = vector.broadcast %4 : vector<8x1xf32> to vector<8x32xf32>
    %6 = arith.subf %0, %5 : vector<8x32xf32>
    %7 = arith.mulf %6, %6 : vector<8x32xf32>
    %cst_2 = arith.constant dense<0.000000e+00> : vector<8xf32>
    %8 = vector.multi_reduction <add>, %7, %cst_2 [1] : vector<8x32xf32> to vector<8xf32>
    %9 = vector.shape_cast %8 : vector<8xf32> to vector<8x1xf32>
    %cst_3 = arith.constant 3.200000e+01 : f32
    %10 = vector.broadcast %cst_3 : f32 to vector<8x1xf32>
    %11 = arith.divf %9, %10 : vector<8x1xf32>
    %12 = vector.broadcast %4 : vector<8x1xf32> to vector<8x32xf32>
    %13 = arith.subf %0, %12 : vector<8x32xf32>
    %cst_4 = arith.constant 9.99999974E-6 : f32
    %14 = vector.broadcast %cst_4 : f32 to vector<8x1xf32>
    %15 = arith.addf %11, %14 : vector<8x1xf32>
    %16 = math.rsqrt %15 : vector<8x1xf32>
    %17 = vector.broadcast %16 : vector<8x1xf32> to vector<8x32xf32>
    %18 = arith.mulf %13, %17 : vector<8x32xf32>
    %c0_5 = arith.constant 0 : index
    %c0_6 = arith.constant 0 : index
    %19 = vector.load %arg5[%c0_5, %c0_6] : memref<1x32xf32, #tpu.memory_space<vmem>>, vector<1x32xf32>
    %20 = vector.broadcast %19 : vector<1x32xf32> to vector<8x32xf32>
    %21 = arith.mulf %18, %20 : vector<8x32xf32>
    %c0_7 = arith.constant 0 : index
    %c0_8 = arith.constant 0 : index
    %22 = vector.load %arg6[%c0_7, %c0_8] : memref<1x32xf32, #tpu.memory_space<vmem>>, vector<1x32xf32>
    %23 = vector.broadcast %22 : vector<1x32xf32> to vector<8x32xf32>
    %24 = arith.addf %21, %23 : vector<8x32xf32>
    %25 = arith.truncf %24 : vector<8x32xf32> to vector<8x32xbf16>
    %c0_9 = arith.constant 0 : index
    %c0_10 = arith.constant 0 : index
    %26 = vector.load %arg2[%c0_9, %c0_10] : memref<32x96xbf16, #tpu.memory_space<vmem>>, vector<32x96xbf16>
    %cst_11 = arith.constant dense<0.000000e+00> : vector<8x96xf32>
    %27 = tpu.matmul %25, %26, %cst_11 {dimension_numbers = #tpu.dot_dimension_numbers<[1], [0], [0], [1], [0, 0, 1, 1], [], []>} : vector<8x32xbf16>, vector<32x96xbf16>, vector<8x96xf32> -> vector<8x96xf32>
    %28 = vector.extract_strided_slice %27 {offsets = [0, 0], sizes = [8, 8], strides = [1, 1]} : vector<8x96xf32> to vector<8x8xf32>
    %29 = vector.shape_cast %28 : vector<8x8xf32> to vector<1x8x8xf32>
    %30 = vector.extract_strided_slice %27 {offsets = [0, 32], sizes = [8, 8], strides = [1, 1]} : vector<8x96xf32> to vector<8x8xf32>
    %31 = vector.shape_cast %30 : vector<8x8xf32> to vector<1x8x8xf32>
    %32 = vector.extract_strided_slice %27 {offsets = [0, 64], sizes = [8, 8], strides = [1, 1]} : vector<8x96xf32> to vector<8x8xf32>
    %33 = vector.shape_cast %32 : vector<8x8xf32> to vector<1x8x8xf32>
    %34 = arith.mulf %29, %29 : vector<1x8x8xf32>
    %cst_12 = arith.constant dense<0.000000e+00> : vector<1x8xf32>
    %35 = vector.multi_reduction <add>, %34, %cst_12 [2] : vector<1x8x8xf32> to vector<1x8xf32>
    %36 = vector.shape_cast %35 : vector<1x8xf32> to vector<1x8x1xf32>
    %37 = arith.mulf %31, %31 : vector<1x8x8xf32>
    %cst_13 = arith.constant dense<0.000000e+00> : vector<1x8xf32>
    %38 = vector.multi_reduction <add>, %37, %cst_13 [2] : vector<1x8x8xf32> to vector<1x8xf32>
    %39 = vector.shape_cast %38 : vector<1x8xf32> to vector<1x1x8xf32>
    "tpu.trace_start"() <{level = 10 : i32, message = "btd,bsd->bts"}> : () -> ()
    %cst_14 = arith.constant dense<0.000000e+00> : vector<1x8x8xf32>
    %40 = tpu.matmul %29, %31, %cst_14 {dimension_numbers = #tpu.dot_dimension_numbers<[2], [2], [1], [1], [0, 0, 0, 1, 1, 1], [0], [0]>} : vector<1x8x8xf32>, vector<1x8x8xf32>, vector<1x8x8xf32> -> vector<1x8x8xf32>
    "tpu.trace_stop"() : () -> ()
    %41 = vector.broadcast %36 : vector<1x8x1xf32> to vector<1x8x8xf32>
    %42 = vector.broadcast %39 : vector<1x1x8xf32> to vector<1x8x8xf32>
    %43 = arith.addf %41, %42 : vector<1x8x8xf32>
    %cst_15 = arith.constant 2.000000e+00 : f32
    %44 = vector.broadcast %cst_15 : f32 to vector<1x8x8xf32>
    %45 = arith.mulf %44, %40 : vector<1x8x8xf32>
    %46 = arith.subf %43, %45 : vector<1x8x8xf32>
    %cst_16 = arith.constant 0.000000e+00 : f32
    %47 = vector.broadcast %cst_16 : f32 to vector<1x8x8xf32>
    %48 = arith.maximumf %46, %47 : vector<1x8x8xf32>
    %49 = math.sqrt %48 : vector<1x8x8xf32>
    %cst_17 = arith.constant 0.176776692 : f32
    %50 = vector.broadcast %cst_17 : f32 to vector<1x8x8xf32>
    %51 = arith.mulf %49, %50 : vector<1x8x8xf32>
    %cst_18 = arith.constant dense<0xFF800000> : vector<1x8xf32>
    %52 = vector.multi_reduction <maximumf>, %51, %cst_18 [2] : vector<1x8x8xf32> to vector<1x8xf32>
    %53 = vector.shape_cast %52 : vector<1x8xf32> to vector<1x8x1xf32>
    %54 = vector.broadcast %53 : vector<1x8x1xf32> to vector<1x8x8xf32>
    %55 = arith.subf %51, %54 : vector<1x8x8xf32>
    %56 = math.exp %55 : vector<1x8x8xf32>
    %cst_19 = arith.constant dense<0.000000e+00> : vector<1x8xf32>
    %57 = vector.multi_reduction <add>, %56, %cst_19 [2] : vector<1x8x8xf32> to vector<1x8xf32>
    %58 = vector.shape_cast %57 : vector<1x8xf32> to vector<1x8x1xf32>
    %59 = tpu.reciprocal %58 {approx = true} : vector<1x8x1xf32> -> vector<1x8x1xf32>
    %60 = vector.broadcast %59 : vector<1x8x1xf32> to vector<1x8x8xf32>
    %61 = arith.mulf %56, %60 : vector<1x8x8xf32>
    %62 = arith.truncf %61 : vector<1x8x8xf32> to vector<1x8x8xbf16>
    %63 = arith.truncf %33 : vector<1x8x8xf32> to vector<1x8x8xbf16>
    "tpu.trace_start"() <{level = 10 : i32, message = "bts,bsd->btd"}> : () -> ()
    %cst_20 = arith.constant dense<0.000000e+00> : vector<1x8x8xf32>
    %64 = tpu.matmul %62, %63, %cst_20 {dimension_numbers = #tpu.dot_dimension_numbers<[2], [1], [1], [2], [0, 0, 0, 1, 1, 2], [0], [0]>} : vector<1x8x8xbf16>, vector<1x8x8xbf16>, vector<1x8x8xf32> -> vector<1x8x8xf32>
    "tpu.trace_stop"() : () -> ()
    %65 = vector.shape_cast %64 : vector<1x8x8xf32> to vector<8x8xf32>
    %66 = vector.extract_strided_slice %27 {offsets = [0, 8], sizes = [8, 8], strides = [1, 1]} : vector<8x96xf32> to vector<8x8xf32>
    %67 = vector.shape_cast %66 : vector<8x8xf32> to vector<1x8x8xf32>
    %68 = vector.extract_strided_slice %27 {offsets = [0, 40], sizes = [8, 8], strides = [1, 1]} : vector<8x96xf32> to vector<8x8xf32>
    %69 = vector.shape_cast %68 : vector<8x8xf32> to vector<1x8x8xf32>
    %70 = vector.extract_strided_slice %27 {offsets = [0, 72], sizes = [8, 8], strides = [1, 1]} : vector<8x96xf32> to vector<8x8xf32>
    %71 = vector.shape_cast %70 : vector<8x8xf32> to vector<1x8x8xf32>
    %72 = arith.mulf %67, %67 : vector<1x8x8xf32>
    %cst_21 = arith.constant dense<0.000000e+00> : vector<1x8xf32>
    %73 = vector.multi_reduction <add>, %72, %cst_21 [2] : vector<1x8x8xf32> to vector<1x8xf32>
    %74 = vector.shape_cast %73 : vector<1x8xf32> to vector<1x8x1xf32>
    %75 = arith.mulf %69, %69 : vector<1x8x8xf32>
    %cst_22 = arith.constant dense<0.000000e+00> : vector<1x8xf32>
    %76 = vector.multi_reduction <add>, %75, %cst_22 [2] : vector<1x8x8xf32> to vector<1x8xf32>
    %77 = vector.shape_cast %76 : vector<1x8xf32> to vector<1x1x8xf32>
    "tpu.trace_start"() <{level = 10 : i32, message = "btd,bsd->bts"}> : () -> ()
    %cst_23 = arith.constant dense<0.000000e+00> : vector<1x8x8xf32>
    %78 = tpu.matmul %67, %69, %cst_23 {dimension_numbers = #tpu.dot_dimension_numbers<[2], [2], [1], [1], [0, 0, 0, 1, 1, 1], [0], [0]>} : vector<1x8x8xf32>, vector<1x8x8xf32>, vector<1x8x8xf32> -> vector<1x8x8xf32>
    "tpu.trace_stop"() : () -> ()
    %79 = vector.broadcast %74 : vector<1x8x1xf32> to vector<1x8x8xf32>
    %80 = vector.broadcast %77 : vector<1x1x8xf32> to vector<1x8x8xf32>
    %81 = arith.addf %79, %80 : vector<1x8x8xf32>
    %cst_24 = arith.constant 2.000000e+00 : f32
    %82 = vector.broadcast %cst_24 : f32 to vector<1x8x8xf32>
    %83 = arith.mulf %82, %78 : vector<1x8x8xf32>
    %84 = arith.subf %81, %83 : vector<1x8x8xf32>
    %cst_25 = arith.constant 0.000000e+00 : f32
    %85 = vector.broadcast %cst_25 : f32 to vector<1x8x8xf32>
    %86 = arith.maximumf %84, %85 : vector<1x8x8xf32>
    %87 = math.sqrt %86 : vector<1x8x8xf32>
    %cst_26 = arith.constant 0.176776692 : f32
    %88 = vector.broadcast %cst_26 : f32 to vector<1x8x8xf32>
    %89 = arith.mulf %87, %88 : vector<1x8x8xf32>
    %cst_27 = arith.constant dense<0xFF800000> : vector<1x8xf32>
    %90 = vector.multi_reduction <maximumf>, %89, %cst_27 [2] : vector<1x8x8xf32> to vector<1x8xf32>
    %91 = vector.shape_cast %90 : vector<1x8xf32> to vector<1x8x1xf32>
    %92 = vector.broadcast %91 : vector<1x8x1xf32> to vector<1x8x8xf32>
    %93 = arith.subf %89, %92 : vector<1x8x8xf32>
    %94 = math.exp %93 : vector<1x8x8xf32>
    %cst_28 = arith.constant dense<0.000000e+00> : vector<1x8xf32>
    %95 = vector.multi_reduction <add>, %94, %cst_28 [2] : vector<1x8x8xf32> to vector<1x8xf32>
    %96 = vector.shape_cast %95 : vector<1x8xf32> to vector<1x8x1xf32>
    %97 = tpu.reciprocal %96 {approx = true} : vector<1x8x1xf32> -> vector<1x8x1xf32>
    %98 = vector.broadcast %97 : vector<1x8x1xf32> to vector<1x8x8xf32>
    %99 = arith.mulf %94, %98 : vector<1x8x8xf32>
    %100 = arith.truncf %99 : vector<1x8x8xf32> to vector<1x8x8xbf16>
    %101 = arith.truncf %71 : vector<1x8x8xf32> to vector<1x8x8xbf16>
    "tpu.trace_start"() <{level = 10 : i32, message = "bts,bsd->btd"}> : () -> ()
    %cst_29 = arith.constant dense<0.000000e+00> : vector<1x8x8xf32>
    %102 = tpu.matmul %100, %101, %cst_29 {dimension_numbers = #tpu.dot_dimension_numbers<[2], [1], [1], [2], [0, 0, 0, 1, 1, 2], [0], [0]>} : vector<1x8x8xbf16>, vector<1x8x8xbf16>, vector<1x8x8xf32> -> vector<1x8x8xf32>
    "tpu.trace_stop"() : () -> ()
    %103 = vector.shape_cast %102 : vector<1x8x8xf32> to vector<8x8xf32>
    %104 = vector.extract_strided_slice %27 {offsets = [0, 16], sizes = [8, 8], strides = [1, 1]} : vector<8x96xf32> to vector<8x8xf32>
    %105 = vector.shape_cast %104 : vector<8x8xf32> to vector<1x8x8xf32>
    %106 = vector.extract_strided_slice %27 {offsets = [0, 48], sizes = [8, 8], strides = [1, 1]} : vector<8x96xf32> to vector<8x8xf32>
    %107 = vector.shape_cast %106 : vector<8x8xf32> to vector<1x8x8xf32>
    %108 = vector.extract_strided_slice %27 {offsets = [0, 80], sizes = [8, 8], strides = [1, 1]} : vector<8x96xf32> to vector<8x8xf32>
    %109 = vector.shape_cast %108 : vector<8x8xf32> to vector<1x8x8xf32>
    %110 = arith.mulf %105, %105 : vector<1x8x8xf32>
    %cst_30 = arith.constant dense<0.000000e+00> : vector<1x8xf32>
    %111 = vector.multi_reduction <add>, %110, %cst_30 [2] : vector<1x8x8xf32> to vector<1x8xf32>
    %112 = vector.shape_cast %111 : vector<1x8xf32> to vector<1x8x1xf32>
    %113 = arith.mulf %107, %107 : vector<1x8x8xf32>
    %cst_31 = arith.constant dense<0.000000e+00> : vector<1x8xf32>
    %114 = vector.multi_reduction <add>, %113, %cst_31 [2] : vector<1x8x8xf32> to vector<1x8xf32>
    %115 = vector.shape_cast %114 : vector<1x8xf32> to vector<1x1x8xf32>
    "tpu.trace_start"() <{level = 10 : i32, message = "btd,bsd->bts"}> : () -> ()
    %cst_32 = arith.constant dense<0.000000e+00> : vector<1x8x8xf32>
    %116 = tpu.matmul %105, %107, %cst_32 {dimension_numbers = #tpu.dot_dimension_numbers<[2], [2], [1], [1], [0, 0, 0, 1, 1, 1], [0], [0]>} : vector<1x8x8xf32>, vector<1x8x8xf32>, vector<1x8x8xf32> -> vector<1x8x8xf32>
    "tpu.trace_stop"() : () -> ()
    %117 = vector.broadcast %112 : vector<1x8x1xf32> to vector<1x8x8xf32>
    %118 = vector.broadcast %115 : vector<1x1x8xf32> to vector<1x8x8xf32>
    %119 = arith.addf %117, %118 : vector<1x8x8xf32>
    %cst_33 = arith.constant 2.000000e+00 : f32
    %120 = vector.broadcast %cst_33 : f32 to vector<1x8x8xf32>
    %121 = arith.mulf %120, %116 : vector<1x8x8xf32>
    %122 = arith.subf %119, %121 : vector<1x8x8xf32>
    %cst_34 = arith.constant 0.000000e+00 : f32
    %123 = vector.broadcast %cst_34 : f32 to vector<1x8x8xf32>
    %124 = arith.maximumf %122, %123 : vector<1x8x8xf32>
    %125 = math.sqrt %124 : vector<1x8x8xf32>
    %cst_35 = arith.constant 0.176776692 : f32
    %126 = vector.broadcast %cst_35 : f32 to vector<1x8x8xf32>
    %127 = arith.mulf %125, %126 : vector<1x8x8xf32>
    %cst_36 = arith.constant dense<0xFF800000> : vector<1x8xf32>
    %128 = vector.multi_reduction <maximumf>, %127, %cst_36 [2] : vector<1x8x8xf32> to vector<1x8xf32>
    %129 = vector.shape_cast %128 : vector<1x8xf32> to vector<1x8x1xf32>
    %130 = vector.broadcast %129 : vector<1x8x1xf32> to vector<1x8x8xf32>
    %131 = arith.subf %127, %130 : vector<1x8x8xf32>
    %132 = math.exp %131 : vector<1x8x8xf32>
    %cst_37 = arith.constant dense<0.000000e+00> : vector<1x8xf32>
    %133 = vector.multi_reduction <add>, %132, %cst_37 [2] : vector<1x8x8xf32> to vector<1x8xf32>
    %134 = vector.shape_cast %133 : vector<1x8xf32> to vector<1x8x1xf32>
    %135 = tpu.reciprocal %134 {approx = true} : vector<1x8x1xf32> -> vector<1x8x1xf32>
    %136 = vector.broadcast %135 : vector<1x8x1xf32> to vector<1x8x8xf32>
    %137 = arith.mulf %132, %136 : vector<1x8x8xf32>
    %138 = arith.truncf %137 : vector<1x8x8xf32> to vector<1x8x8xbf16>
    %139 = arith.truncf %109 : vector<1x8x8xf32> to vector<1x8x8xbf16>
    "tpu.trace_start"() <{level = 10 : i32, message = "bts,bsd->btd"}> : () -> ()
    %cst_38 = arith.constant dense<0.000000e+00> : vector<1x8x8xf32>
    %140 = tpu.matmul %138, %139, %cst_38 {dimension_numbers = #tpu.dot_dimension_numbers<[2], [1], [1], [2], [0, 0, 0, 1, 1, 2], [0], [0]>} : vector<1x8x8xbf16>, vector<1x8x8xbf16>, vector<1x8x8xf32> -> vector<1x8x8xf32>
    "tpu.trace_stop"() : () -> ()
    %141 = vector.shape_cast %140 : vector<1x8x8xf32> to vector<8x8xf32>
    %142 = vector.extract_strided_slice %27 {offsets = [0, 24], sizes = [8, 8], strides = [1, 1]} : vector<8x96xf32> to vector<8x8xf32>
    %143 = vector.shape_cast %142 : vector<8x8xf32> to vector<1x8x8xf32>
    %144 = vector.extract_strided_slice %27 {offsets = [0, 56], sizes = [8, 8], strides = [1, 1]} : vector<8x96xf32> to vector<8x8xf32>
    %145 = vector.shape_cast %144 : vector<8x8xf32> to vector<1x8x8xf32>
    %146 = vector.extract_strided_slice %27 {offsets = [0, 88], sizes = [8, 8], strides = [1, 1]} : vector<8x96xf32> to vector<8x8xf32>
    %147 = vector.shape_cast %146 : vector<8x8xf32> to vector<1x8x8xf32>
    %148 = arith.mulf %143, %143 : vector<1x8x8xf32>
    %cst_39 = arith.constant dense<0.000000e+00> : vector<1x8xf32>
    %149 = vector.multi_reduction <add>, %148, %cst_39 [2] : vector<1x8x8xf32> to vector<1x8xf32>
    %150 = vector.shape_cast %149 : vector<1x8xf32> to vector<1x8x1xf32>
    %151 = arith.mulf %145, %145 : vector<1x8x8xf32>
    %cst_40 = arith.constant dense<0.000000e+00> : vector<1x8xf32>
    %152 = vector.multi_reduction <add>, %151, %cst_40 [2] : vector<1x8x8xf32> to vector<1x8xf32>
    %153 = vector.shape_cast %152 : vector<1x8xf32> to vector<1x1x8xf32>
    "tpu.trace_start"() <{level = 10 : i32, message = "btd,bsd->bts"}> : () -> ()
    %cst_41 = arith.constant dense<0.000000e+00> : vector<1x8x8xf32>
    %154 = tpu.matmul %143, %145, %cst_41 {dimension_numbers = #tpu.dot_dimension_numbers<[2], [2], [1], [1], [0, 0, 0, 1, 1, 1], [0], [0]>} : vector<1x8x8xf32>, vector<1x8x8xf32>, vector<1x8x8xf32> -> vector<1x8x8xf32>
    "tpu.trace_stop"() : () -> ()
    %155 = vector.broadcast %150 : vector<1x8x1xf32> to vector<1x8x8xf32>
    %156 = vector.broadcast %153 : vector<1x1x8xf32> to vector<1x8x8xf32>
    %157 = arith.addf %155, %156 : vector<1x8x8xf32>
    %cst_42 = arith.constant 2.000000e+00 : f32
    %158 = vector.broadcast %cst_42 : f32 to vector<1x8x8xf32>
    %159 = arith.mulf %158, %154 : vector<1x8x8xf32>
    %160 = arith.subf %157, %159 : vector<1x8x8xf32>
    %cst_43 = arith.constant 0.000000e+00 : f32
    %161 = vector.broadcast %cst_43 : f32 to vector<1x8x8xf32>
    %162 = arith.maximumf %160, %161 : vector<1x8x8xf32>
    %163 = math.sqrt %162 : vector<1x8x8xf32>
    %cst_44 = arith.constant 0.176776692 : f32
    %164 = vector.broadcast %cst_44 : f32 to vector<1x8x8xf32>
    %165 = arith.mulf %163, %164 : vector<1x8x8xf32>
    %cst_45 = arith.constant dense<0xFF800000> : vector<1x8xf32>
    %166 = vector.multi_reduction <maximumf>, %165, %cst_45 [2] : vector<1x8x8xf32> to vector<1x8xf32>
    %167 = vector.shape_cast %166 : vector<1x8xf32> to vector<1x8x1xf32>
    %168 = vector.broadcast %167 : vector<1x8x1xf32> to vector<1x8x8xf32>
    %169 = arith.subf %165, %168 : vector<1x8x8xf32>
    %170 = math.exp %169 : vector<1x8x8xf32>
    %cst_46 = arith.constant dense<0.000000e+00> : vector<1x8xf32>
    %171 = vector.multi_reduction <add>, %170, %cst_46 [2] : vector<1x8x8xf32> to vector<1x8xf32>
    %172 = vector.shape_cast %171 : vector<1x8xf32> to vector<1x8x1xf32>
    %173 = tpu.reciprocal %172 {approx = true} : vector<1x8x1xf32> -> vector<1x8x1xf32>
    %174 = vector.broadcast %173 : vector<1x8x1xf32> to vector<1x8x8xf32>
    %175 = arith.mulf %170, %174 : vector<1x8x8xf32>
    %176 = arith.truncf %175 : vector<1x8x8xf32> to vector<1x8x8xbf16>
    %177 = arith.truncf %147 : vector<1x8x8xf32> to vector<1x8x8xbf16>
    "tpu.trace_start"() <{level = 10 : i32, message = "bts,bsd->btd"}> : () -> ()
    %cst_47 = arith.constant dense<0.000000e+00> : vector<1x8x8xf32>
    %178 = tpu.matmul %176, %177, %cst_47 {dimension_numbers = #tpu.dot_dimension_numbers<[2], [1], [1], [2], [0, 0, 0, 1, 1, 2], [0], [0]>} : vector<1x8x8xbf16>, vector<1x8x8xbf16>, vector<1x8x8xf32> -> vector<1x8x8xf32>
    "tpu.trace_stop"() : () -> ()
    %179 = vector.shape_cast %178 : vector<1x8x8xf32> to vector<8x8xf32>
    %180 = tpu.concatenate %65, %103, %141, %179 in 1 : vector<8x8xf32>, vector<8x8xf32>, vector<8x8xf32>, vector<8x8xf32> -> vector<8x32xf32>
    %181 = arith.truncf %180 : vector<8x32xf32> to vector<8x32xbf16>
    %c0_48 = arith.constant 0 : index
    %c0_49 = arith.constant 0 : index
    %182 = vector.load %arg3[%c0_48, %c0_49] : memref<32x32xbf16, #tpu.memory_space<vmem>>, vector<32x32xbf16>
    %cst_50 = arith.constant dense<0.000000e+00> : vector<8x32xf32>
    %183 = tpu.matmul %181, %182, %cst_50 {dimension_numbers = #tpu.dot_dimension_numbers<[1], [0], [0], [1], [0, 0, 1, 1], [], []>} : vector<8x32xbf16>, vector<32x32xbf16>, vector<8x32xf32> -> vector<8x32xf32>
    %c0_51 = arith.constant 0 : index
    %c0_52 = arith.constant 0 : index
    %184 = vector.load %arg4[%c0_51, %c0_52] : memref<1x32xf32, #tpu.memory_space<vmem>>, vector<1x32xf32>
    %185 = vector.broadcast %184 : vector<1x32xf32> to vector<8x32xf32>
    %186 = arith.addf %183, %185 : vector<8x32xf32>
    %187 = arith.addf %0, %186 : vector<8x32xf32>
    %cst_53 = arith.constant dense<0.000000e+00> : vector<8xf32>
    %188 = vector.multi_reduction <add>, %187, %cst_53 [1] : vector<8x32xf32> to vector<8xf32>
    %189 = vector.shape_cast %188 : vector<8xf32> to vector<8x1xf32>
    %cst_54 = arith.constant 3.200000e+01 : f32
    %190 = vector.broadcast %cst_54 : f32 to vector<8x1xf32>
    %191 = arith.divf %189, %190 : vector<8x1xf32>
    %192 = vector.broadcast %191 : vector<8x1xf32> to vector<8x32xf32>
    %193 = arith.subf %187, %192 : vector<8x32xf32>
    %194 = arith.mulf %193, %193 : vector<8x32xf32>
    %cst_55 = arith.constant dense<0.000000e+00> : vector<8xf32>
    %195 = vector.multi_reduction <add>, %194, %cst_55 [1] : vector<8x32xf32> to vector<8xf32>
    %196 = vector.shape_cast %195 : vector<8xf32> to vector<8x1xf32>
    %cst_56 = arith.constant 3.200000e+01 : f32
    %197 = vector.broadcast %cst_56 : f32 to vector<8x1xf32>
    %198 = arith.divf %196, %197 : vector<8x1xf32>
    %199 = vector.broadcast %191 : vector<8x1xf32> to vector<8x32xf32>
    %200 = arith.subf %187, %199 : vector<8x32xf32>
    %cst_57 = arith.constant 9.99999974E-6 : f32
    %201 = vector.broadcast %cst_57 : f32 to vector<8x1xf32>
    %202 = arith.addf %198, %201 : vector<8x1xf32>
    %203 = math.rsqrt %202 : vector<8x1xf32>
    %204 = vector.broadcast %203 : vector<8x1xf32> to vector<8x32xf32>
    %205 = arith.mulf %200, %204 : vector<8x32xf32>
    %c0_58 = arith.constant 0 : index
    %c0_59 = arith.constant 0 : index
    %206 = vector.load %arg7[%c0_58, %c0_59] : memref<1x32xf32, #tpu.memory_space<vmem>>, vector<1x32xf32>
    %207 = vector.broadcast %206 : vector<1x32xf32> to vector<8x32xf32>
    %208 = arith.mulf %205, %207 : vector<8x32xf32>
    %c0_60 = arith.constant 0 : index
    %c0_61 = arith.constant 0 : index
    %209 = vector.load %arg8[%c0_60, %c0_61] : memref<1x32xf32, #tpu.memory_space<vmem>>, vector<1x32xf32>
    %210 = vector.broadcast %209 : vector<1x32xf32> to vector<8x32xf32>
    %211 = arith.addf %208, %210 : vector<8x32xf32>
    %212 = arith.truncf %211 : vector<8x32xf32> to vector<8x32xbf16>
    %c0_62 = arith.constant 0 : index
    %c0_63 = arith.constant 0 : index
    %213 = vector.load %arg9[%c0_62, %c0_63] : memref<32x128xbf16, #tpu.memory_space<vmem>>, vector<32x128xbf16>
    %cst_64 = arith.constant dense<0.000000e+00> : vector<8x128xf32>
    %214 = tpu.matmul %212, %213, %cst_64 {dimension_numbers = #tpu.dot_dimension_numbers<[1], [0], [0], [1], [0, 0, 1, 1], [], []>} : vector<8x32xbf16>, vector<32x128xbf16>, vector<8x128xf32> -> vector<8x128xf32>
    %c0_65 = arith.constant 0 : index
    %c0_66 = arith.constant 0 : index
    %215 = vector.load %arg10[%c0_65, %c0_66] : memref<1x128xf32, #tpu.memory_space<vmem>>, vector<1x128xf32>
    %216 = vector.broadcast %215 : vector<1x128xf32> to vector<8x128xf32>
    %217 = arith.addf %214, %216 : vector<8x128xf32>
    %cst_67 = arith.constant 5.000000e-01 : f32
    %218 = vector.broadcast %cst_67 : f32 to vector<8x128xf32>
    %219 = arith.mulf %218, %217 : vector<8x128xf32>
    %cst_68 = arith.constant 0.707106769 : f32
    %220 = vector.broadcast %cst_68 : f32 to vector<8x128xf32>
    %221 = arith.mulf %217, %220 : vector<8x128xf32>
    %222 = math.erf %221 : vector<8x128xf32>
    %cst_69 = arith.constant 1.000000e+00 : f32
    %223 = vector.broadcast %cst_69 : f32 to vector<8x128xf32>
    %224 = arith.addf %223, %222 : vector<8x128xf32>
    %225 = arith.mulf %219, %224 : vector<8x128xf32>
    %226 = arith.truncf %225 : vector<8x128xf32> to vector<8x128xbf16>
    %c0_70 = arith.constant 0 : index
    %c0_71 = arith.constant 0 : index
    %227 = vector.load %arg11[%c0_70, %c0_71] : memref<128x32xbf16, #tpu.memory_space<vmem>>, vector<128x32xbf16>
    %cst_72 = arith.constant dense<0.000000e+00> : vector<8x32xf32>
    %228 = tpu.matmul %226, %227, %cst_72 {dimension_numbers = #tpu.dot_dimension_numbers<[1], [0], [0], [1], [0, 0, 1, 1], [], []>} : vector<8x128xbf16>, vector<128x32xbf16>, vector<8x32xf32> -> vector<8x32xf32>
    %c0_73 = arith.constant 0 : index
    %c0_74 = arith.constant 0 : index
    %229 = vector.load %arg12[%c0_73, %c0_74] : memref<1x32xf32, #tpu.memory_space<vmem>>, vector<1x32xf32>
    %230 = vector.broadcast %229 : vector<1x32xf32> to vector<8x32xf32>
    %231 = arith.addf %228, %230 : vector<8x32xf32>
    %232 = arith.addf %187, %231 : vector<8x32xf32>
    %c0_75 = arith.constant 0 : index
    %c0_76 = arith.constant 0 : index
    %233 = vector.load %arg13[%c0_75, %c0_76] : memref<8x32xf32, #tpu.memory_space<vmem>>, vector<8x32xf32>
    tpu.vector_store %arg13[%c0_75, %c0_76], %232 {strides = array<i32>} : memref<8x32xf32, #tpu.memory_space<vmem>>, vector<8x32xf32>,
    return
  }
  func.func @transform_0(%arg0: i32) -> (i32, i32) {
    %c0_i32 = arith.constant 0 : i32
    %c0_i32_0 = arith.constant 0 : i32
    return %arg0, %c0_i32 : i32, i32
  }
  func.func @transform_1(%arg0: i32) -> (i32, i32) {
    %c0_i32 = arith.constant 0 : i32
    %c0_i32_0 = arith.constant 0 : i32
    %c0_i32_1 = arith.constant 0 : i32
    return %c0_i32, %c0_i32_0 : i32, i32
  }
  func.func @transform_2(%arg0: i32) -> (i32, i32) {
    %c0_i32 = arith.constant 0 : i32
    %c0_i32_0 = arith.constant 0 : i32
    %c0_i32_1 = arith.constant 0 : i32
    return %c0_i32, %c0_i32_0 : i32, i32
  }
  func.func @transform_3(%arg0: i32) -> (i32, i32) {
    %c0_i32 = arith.constant 0 : i32
    %c0_i32_0 = arith.constant 0 : i32
    %c0_i32_1 = arith.constant 0 : i32
    return %c0_i32, %c0_i32_0 : i32, i32
  }
  func.func @transform_4(%arg0: i32) -> (i32, i32) {
    %c0_i32 = arith.constant 0 : i32
    %c0_i32_0 = arith.constant 0 : i32
    %c0_i32_1 = arith.constant 0 : i32
    return %c0_i32, %c0_i32_0 : i32, i32
  }
  func.func @transform_5(%arg0: i32) -> (i32, i32) {
    %c0_i32 = arith.constant 0 : i32
    %c0_i32_0 = arith.constant 0 : i32
    %c0_i32_1 = arith.constant 0 : i32
    return %c0_i32, %c0_i32_0 : i32, i32
  }
  func.func @transform_6(%arg0: i32) -> (i32, i32) {
    %c0_i32 = arith.constant 0 : i32
    %c0_i32_0 = arith.constant 0 : i32
    %c0_i32_1 = arith.constant 0 : i32
    return %c0_i32, %c0_i32_0 : i32, i32
  }
  func.func @transform_7(%arg0: i32) -> (i32, i32) {
    %c0_i32 = arith.constant 0 : i32
    %c0_i32_0 = arith.constant 0 : i32
    %c0_i32_1 = arith.constant 0 : i32
    return %c0_i32, %c0_i32_0 : i32, i32
  }
  func.func @transform_8(%arg0: i32) -> (i32, i32) {
    %c0_i32 = arith.constant 0 : i32
    %c0_i32_0 = arith.constant 0 : i32
    %c0_i32_1 = arith.constant 0 : i32
    return %c0_i32, %c0_i32_0 : i32, i32
  }
  func.func @transform_9(%arg0: i32) -> (i32, i32) {
    %c0_i32 = arith.constant 0 : i32
    %c0_i32_0 = arith.constant 0 : i32
    %c0_i32_1 = arith.constant 0 : i32
    return %c0_i32, %c0_i32_0 : i32, i32
  }
  func.func @transform_10(%arg0: i32) -> (i32, i32) {
    %c0_i32 = arith.constant 0 : i32
    %c0_i32_0 = arith.constant 0 : i32
    %c0_i32_1 = arith.constant 0 : i32
    return %c0_i32, %c0_i32_0 : i32, i32
  }
  func.func @transform_11(%arg0: i32) -> (i32, i32) {
    %c0_i32 = arith.constant 0 : i32
    %c0_i32_0 = arith.constant 0 : i32
    %c0_i32_1 = arith.constant 0 : i32
    return %c0_i32, %c0_i32_0 : i32, i32
  }
  func.func @transform_12(%arg0: i32) -> (i32, i32) {
    %c0_i32 = arith.constant 0 : i32
    %c0_i32_0 = arith.constant 0 : i32
    return %arg0, %c0_i32 : i32, i32
  }
}

</mosaic_0001>

<bundles_post_ra>
// kernel: _dencoder_forward.1
= control target key start
LH: loop header
LB: loop body
LE: loop exit
PB: predicated region body
PF: predicated region fallthrough
CT: control target
= control target key end

     0   :  { %s2293_s0 = inlined_call_operand.vmem [shape: f32[16,32], index: 0, kind: input, shape index: {}]   ;;  %s2294_s1 = inlined_call_operand.vmem [shape: bf16[32,96], index: 1, kind: input, shape index: {}]   ;;  %s2295_s2 = inlined_call_operand.vmem [shape: bf16[32,32], index: 2, kind: input, shape index: {}]   ;;  %s2296_s3 = inlined_call_operand.vmem [shape: f32[1,32], index: 3, kind: input, shape index: {}]   ;;  %s2297_s4 = inlined_call_operand.vmem [shape: f32[1,32], index: 4, kind: input, shape index: {}]   ;;  %s2298_s5 = inlined_call_operand.vmem [shape: f32[1,32], index: 5, kind: input, shape index: {}]   ;;  %s2299_s6 = inlined_call_operand.vmem [shape: f32[1,32], index: 6, kind: input, shape index: {}]   ;;  %s2300_s7 = inlined_call_operand.vmem [shape: f32[1,32], index: 7, kind: input, shape index: {}]   ;;  %s2301_s8 = inlined_call_operand.vmem [shape: bf16[32,128], index: 8, kind: input, shape index: {}]   ;;  %s2302_s9 = inlined_call_operand.vmem [shape: f32[1,128], index: 9, kind: input, shape index: {}]   ;;  %s2303_s10 = inlined_call_operand.vmem [shape: bf16[128,32], index: 10, kind: input, shape index: {}]   ;;  %s2304_s11 = inlined_call_operand.vmem [shape: f32[1,32], index: 11, kind: input, shape index: {}]   ;;  %s2305_s12 = inlined_call_operand.hbm [shape: f32[16,32], index: 12, kind: output, shape index: {}]  }
   0x1   :  { %2306 = sst [smem:[#allocation5_spill]] %s2293_s0 }
   0x2   :  { %2307 = sst [smem:[#allocation6_spill]] %s2294_s1 }
   0x3   :  { %17 = vsyncpa [#allocation3], 0 }
   0x4   :  { %19 = vsyncpa [#allocation3 + $0x1], 0  ;;  %s1994_s21 = smov 0   ;;  %s1996_s22 = smov 0  }
   0x5   :  { %s1998_s23 = smov 0   ;;  %s2000_s24 = smov 0  }
   0x6 LB: > { %s2015_s25 = sadd.s32 4294967295, %s1910_s24   ;;  %s1581_s26 = sadd.s32 4294967294, %s1910_s24   ;;  %s1910_s24 = sphi %s2000_s24, %s2315_s24   ;;  %s1906_s23 = sphi %s1998_s23, %s2314_s23   ;;  %s1902_s22 = sphi %s1996_s22, %s2313_s22   ;;  %s1898_s21 = sphi %s1994_s21, %s2312_s21  }
   0x7   : > { %s2019_s27 = sadd.s32 1, %s1910_s24   ;;  %s289_s28 = sadd.s32 1, %s1906_s23 }
   0x8   : > { %s286_s29 = ssub.s32 %s1910_s24, %s2019_s27  ;;  %p299_p0 = scmp.ne.s32.totalorder %s1906_s23, %s1902_s22 }
   0x9   : > { %p287_p1 = scmp.eq.s32.totalorder %s286_s29, 0  ;;  %p300_p2 = scmp.eq.s32.totalorder %s2015_s25, 1 }
   0xa   : > { %p305_p3 = scmp.ne.s32.totalorder %s1902_s22, %s1898_s21  ;;  %p306_p4 = scmp.eq.s32.totalorder %s1581_s26, 1 }
   0xb   : > { %s2030_s30 = scalar_select %p287_p1, %s1906_s23, %s289_s28  }
   0xc   : > { %p2032_p5 = por %p300_p2, %p299_p0  ;;  %p2036_p6 = por %p306_p4, %p305_p3 }
   0xd   : > { %p1584_p7 = scmp.ge.s32.totalorder %s1910_s24, 1  ;;  %p364_p8 = scmp.lt.s32.totalorder %s1910_s24, 3 }
   0xf   : > { %p365_p9 = pnand %p1584_p7, %p364_p8 }
  0x10   : > { %p405_p10 = scmp.lt.s32.totalorder (!%p365_p9), %s2015_s25, 1  ;;  %vm411_vm0 = vcmask (!%p365_p9), 261120   ;;  %s2310_s0 = sld [smem:[#allocation5_spill]] (!%p365_p9)  ;;  %v1912_v8 = vmov (!%p365_p9), 0.0   ;;  %vm1913_vm1 = vmmov (!%p365_p9), 0   ;;  %vm503_vm2 = vcmask (!%p365_p9), 64512  }
  0x11   : > { %368 = sbr.rel (%p365_p9) target bundleno = 3116 (0xc2c), region = 68  ;;  %s2311_s1 = sld [smem:[#allocation6_spill]] (!%p365_p9)  ;;  %1661 = vmatprep.subr.bf16.mxu1 (!%p365_p9), %v1912_v8  ;;  %1665 = vmatprep.mubr.msk.bf16.mxu1 (!%p365_p9), %vm1913_vm1, %v1912_v8  ;;  %v1587_v14 = vld [vmem:[%s2297_s4] ss:$0 sm:$0xff] (!%p365_p9)  ;;  %v592_v35 = vlaneseq (!%p365_p9)  ;;  %vm642_vm7 = vcmask (!%p365_p9), 1043456   ;;  %vm1221_vm12 = vcmask (!%p365_p9), 130048  }
  0x12   : > { %1680 = vmatprep.subr.mxu0 (!%p365_p9), %v1912_v8  ;;  %1682 = vmatprep.mubr.msk.f32.mxu0 (!%p365_p9), %vm1913_vm1, %v1912_v8  ;;  %v1588_v16 = vld [vmem:[%s2298_s5] ss:$0 sm:$0xff] (!%p365_p9)  ;;  %s1915_s20 = smov (!%p365_p9), 96   ;;  %s1916_s26 = smov (!%p365_p9), 88   ;;  %vm1223_vm13 = vcmask (!%p365_p9), 195584  }
  0x13   : > { %v593_v36 = vand.u32 (!%p365_p9), 127, %v592_v35  ;;  %v595_v37 = vshrl.u32 (!%p365_p9), %v592_v35, 7  ;;  %s1917_s28 = smov (!%p365_p9), 56   ;;  %s1918_s29 = smov (!%p365_p9), 80  }
  0x14   : > { %s1921_s17 = smov (!%p365_p9), 72   ;;  %s1922_s18 = smov (!%p365_p9), 104  }
  0x15   : > { %v2104_v39 = vsub.s32 (!%p365_p9), %v593_v36, %v595_v37 }
  0x17   : > { %v1804_v7 = vld [vmem:[%s2311_s1] sm:$0xff] (!%p365_p9)   ;;  %v1805_v9 = vld [vmem:[%s2311_s1 + $0x8] sm:$0xff] (!%p365_p9)  }
  0x18   : > { %s406_s15 = scalar_select %p405_p10, %s2015_s25, 1  ;;  %1662 = vmatpush3.bf16.msra.mxu1 %v1804_v7 }
  0x19   : > { %1663 = vmatprep.subr.bf16.mxu1 %v1912_v8 }
  0x1a   : > { %s1586_s16 = sshll.u32 %s406_s15, 3  ;;  %s1919_s15 = smov 112  }
  0x1b   : > { %s408_s19 = scalar_lea.vmem %s2310_s0, %s1586_s16  ;;  %s1920_s16 = smov 64  }
  0x1c   : > { %v2047_v0 = vld [vmem:[%s408_s19] sm:$0xff]  ;;  %1664 = vmatpush3.bf16.msra.mxu1 %v1805_v9  ;;  %s1914_s19 = smov 120  }
  0x1d   : > { %v412_v1 = vsel %vm411_vm0, %v2047_v0, 0.0  ;;  %1669 = vmatprep.subr.mxu1 %v1912_v8 }
  0x1e   : > { %413 = vadd.xlane.f32.xlu0 %v412_v1 }
  0xab   : > { %v414_v2 = vpop.xlane.xlu0 %413 }
  0xac   : > { %v416_v3 = vmul.f32 0.03125, %v414_v2 }
  0xae   : > { %v417_v4 = vsub.f32 %v2047_v0, %v416_v3 }
  0xb0   : > { %v418_v5 = vmul.f32 %v417_v4, %v417_v4 }
  0xb2   : > { %v419_v6 = vsel %vm411_vm0, %v418_v5, 0.0 }
  0xb3   : > { %420 = vadd.xlane.f32.xlu0 %v419_v6 }
 0x140   : > { %v421_v10 = vpop.xlane.xlu0 %420 }
 0x141   : > { %v422_v11 = vmul.f32 0.03125, %v421_v10 }
 0x143   : > { %v423_v12 = vadd.f32 1e-05, %v422_v11 }
 0x145   : > { %1818 = vrsqrt.f32 %v423_v12 }
 0x14f   : > { %v1819_v13 = vpop.eup %1818 }
 0x150   : > { %v425_v15 = vmul.f32 %v1819_v13, %v417_v4 }
 0x152   : > { %v433_v17 = vmul.f32 %v1587_v14, %v425_v15 }
 0x154   : > { %v441_v18 = vadd.f32 %v1588_v16, %v433_v17 }
 0x156   : > { %v442_v19 = vpack.c.bf16 %v441_v18, %v441_v18 }
 0x158   : > { %1666 = vmatmul.mubr.msk.bf16.vlgmr.msra.gmra.mrb[0].mxu1 %vm411_vm0, %v442_v19 }
 0x159   : > { %1671 = vmatprep.mubr.msk.f32.mxu1 %vm1913_vm1, %v1912_v8 }
 0x22b   : > { %v2076_v20 = vpop.f32.mrb[0].mxu1 }
 0x22c   : > { %698 = vrot.lane.b32.xlu0 %v2076_v20, %s1914_s19  ;;  %515 = vrot.lane.b32.xlu1 %v2076_v20, %s1915_s20  ;;  %v1667_v21 = vpop.f32.mrb[1].mxu1  ;;  %v2083_v24 = vmul.f32 %v2076_v20, %v2076_v20  ;;  %v2112_v9 = vpack.c.bf16 %v2076_v20, %v2076_v20 }
 0x22d   : > { %v499_v22 = vpop.f32.mrb[2].mxu1 }
 0x22e   : > { %v1668_v23 = vpop.f32.mrb[3].mxu1  ;;  %v504_v25 = vsel %vm503_vm2, %v2083_v24, 0.0 }
 0x230   : > { %700 = vrot.lane.b32.xlu1 %v2076_v20, %s1916_s26 }
 0x234   : > { %508 = vrot.lane.b32.xlu1 %v2083_v24, %s1915_s20  ;;  %s1924_s20 = smov 40  }
 0x238   : > { %692 = vrot.lane.b32.xlu1 %v2083_v24, %s1916_s26  ;;  %s1925_s26 = smov 8  }
 0x23c   : > { %686 = vrot.lane.b32.xlu1 %v2083_v24, %s1914_s19  ;;  %s1923_s19 = smov 48  }
 0x24b   : > { %505 = vadd.xlane.f32.xlu0 %v504_v25 }
 0x29e   : > { %v516_v26 = vpop.permute.xlu1 %515  ;;  %v699_v28 = vpop.permute.xlu0 %698 }
 0x29f   : > { %1670 = vmatpush3.xpose.msk.msra.mxu1 %vm503_vm2, %v516_v26 }
 0x2a0   : > { %1674 = vmatprep.subr.bf16.mxu1 %v1912_v8 }
 0x2a2   : > { %1672 = vmatmul.mubr.msk.f32.vlgmr.msra.gmra.mrb[4].mxu1 %vm503_vm2, %v2076_v20  ;;  %v701_v27 = vpop.permute.xlu1 %700 }
 0x2a3   : > { %1681 = vmatpush3.xpose.msk.msra.mxu0 %vm503_vm2, %v701_v27  ;;  %1676 = vmatprep.mubr.msk.bf16.mxu1 %vm1913_vm1, %v1912_v8 }
 0x2a4   : > { %1691 = vmatprep.subr.mxu0 %v1912_v8 }
 0x2a6   : > { %1683 = vmatmul.mubr.msk.f32.vlgmr.msra.gmra.mrb[0].mxu0 %vm503_vm2, %v699_v28  ;;  %v509_v29 = vpop.permute.xlu1 %508 }
 0x2a7   : > { %v511_v30 = vsel %vm503_vm2, %v509_v29, 0.0  ;;  %1693 = vmatprep.mubr.msk.f32.mxu0 %vm1913_vm1, %v1912_v8 }
 0x2a8   : > { %512 = vadd.xlane.f32.xlu1 %v511_v30 }
 0x2aa   : > { %v693_v31 = vpop.permute.xlu1 %692 }
 0x2ab   : > { %v695_v32 = vsel %vm503_vm2, %v693_v31, 0.0 }
 0x2ac   : > { %696 = vadd.xlane.f32.xlu1 %v695_v32 }
 0x2ae   : > { %v687_v33 = vpop.permute.xlu1 %686 }
 0x2af   : > { %v689_v34 = vsel %vm503_vm2, %v687_v33, 0.0 }
 0x2b0   : > { %690 = vadd.xlane.f32.xlu1 %v689_v34 }
 0x2d8   : > { %v506_v42 = vpop.xlane.xlu0 %505 }
 0x335   : > { %v513_v38 = vpop.xlane.xlu1 %512 }
 0x336   : > { %v597_v41 = vrot.slane %v513_v38, %v2104_v39 }
 0x338   : > { %v611_v44 = vadd.f32 %v597_v41, %v506_v42 }
 0x339   : > { %v697_v40 = vpop.xlane.xlu1 %696 }
 0x33a   : > { %v780_v48 = vrot.slane %v697_v40, %v2104_v39 }
 0x33d   : > { %v691_v47 = vpop.xlane.xlu1 %690 }
 0x33e   : > { %v788_v51 = vadd.f32 %v780_v48, %v691_v47 }
 0x375   : > { %v587_v43 = vpop.f32.mrb[4].mxu1 }
 0x376   : > { %v612_v45 = vmul.f32 2.0, %v587_v43  ;;  %v1673_v46 = vpop.f32.mrb[5].mxu1 }
 0x378   : > { %v613_v49 = vsub.f32 %v611_v44, %v612_v45 }
 0x379   : > { %v772_v50 = vpop.f32.mrb[0].mxu0 }
 0x37a   : > { %v614_v52 = vmax.f32 %v613_v49, 0.0  ;;  %v789_v53 = vmul.f32 2.0, %v772_v50  ;;  %v1684_v54 = vpop.f32.mrb[1].mxu0 }
 0x37c   : > { %v790_v55 = vsub.f32 %v788_v51, %v789_v53  ;;  %1820 = vrsqrt.f32 %v614_v52  ;;  %vm617_vm3 = vcmp.eq.f32.partialorder %v614_v52, inf  ;;  %v620_v59 = vand.u32 2147483648, %v614_v52 }
 0x37d   : > { %vm619_vm4 = vcmp.eq.f32.partialorder %v614_v52, 0.0 }
 0x37e   : > { %v791_v56 = vmax.f32 %v790_v55, 0.0 }
 0x380   : > { %1822 = vrsqrt.f32 %v791_v56  ;;  %vm794_vm5 = vcmp.eq.f32.partialorder %v791_v56, inf  ;;  %v797_v2 = vand.u32 2147483648, %v791_v56  ;;  %vm796_vm6 = vcmp.eq.f32.partialorder %v791_v56, 0.0 }
 0x386   : > { %v1821_v57 = vpop.eup %1820 }
 0x387   : > { %v616_v58 = vmul.f32 %v1821_v57, %v614_v52 }
 0x389   : > { %v618_v60 = vsel %vm617_vm3, %v614_v52, %v616_v58 }
 0x38a   : > { %v1823_v61 = vpop.eup %1822  ;;  %v621_v62 = vsel %vm619_vm4, %v620_v59, %v618_v60 }
 0x38b   : > { %v622_v63 = vmul.f32 0.17677669, %v621_v62  ;;  %v793_v1 = vmul.f32 %v1823_v61, %v791_v56 }
 0x38d   : > { %v623_v3 = vsel %vm503_vm2, %v622_v63, -inf  ;;  %v795_v4 = vsel %vm794_vm5, %v791_v56, %v793_v1 }
 0x38e   : > { %624 = vmax.xlane.f32.xlu0 %v623_v3  ;;  %v798_v5 = vsel %vm796_vm6, %v797_v2, %v795_v4 }
 0x38f   : > { %v799_v6 = vmul.f32 0.17677669, %v798_v5 }
 0x391   : > { %v800_v7 = vsel %vm503_vm2, %v799_v6, -inf }
 0x392   : > { %801 = vmax.xlane.f32.xlu1 %v800_v7 }
 0x3a3   : > { %812 = vrot.lane.b32.xlu1 %v2112_v9, %s1917_s28  ;;  %s1928_s28 = smov [#allocation2]  }
 0x3a7   : > { %874 = vrot.lane.b32.xlu1 %v2076_v20, %s1918_s29 }
 0x41b   : > { %v625_v10 = vpop.xlane.xlu0 %624 }
 0x41c   : > { %v626_v11 = vsub.f32 %v622_v63, %v625_v10 }
 0x41e   : > { %v627_v12 = vmul.f32 1.442695, %v626_v11 }
 0x41f   : > { %v802_v13 = vpop.xlane.xlu1 %801 }
 0x420   : > { %1824 = vpow2.f32 %v627_v12  ;;  %v803_v14 = vsub.f32 %v799_v6, %v802_v13 }
 0x422   : > { %v804_v15 = vmul.f32 1.442695, %v803_v14 }
 0x423   : > { %v813_v16 = vpop.permute.xlu1 %812 }
 0x424   : > { %1826 = vpow2.f32 %v804_v15  ;;  %v818_v35 = vsel %vm642_vm7, %v813_v16, 0 }
 0x427   : > { %v875_v17 = vpop.permute.xlu1 %874 }
 0x428   : > { %1692 = vmatpush3.xpose.msk.msra.mxu0 %vm503_vm2, %v875_v17 }
 0x429   : > { %1696 = vmatprep.subr.bf16.mxu0 %v1912_v8 }
 0x42a   : > { %v1825_v18 = vpop.eup %1824 }
 0x42b   : > { %v629_v19 = vsel %vm503_vm2, %v1825_v18, 0.0 }
 0x42c   : > { %630 = vadd.xlane.f32.xlu0 %v629_v19 }
 0x42e   : > { %v1827_v21 = vpop.eup %1826 }
 0x42f   : > { %v806_v22 = vsel %vm503_vm2, %v1827_v21, 0.0 }
 0x430   : > { %807 = vadd.xlane.f32.xlu1 %v806_v22 }
 0x441   : > { %872 = vrot.lane.b32.xlu1 %v2076_v20, %s1919_s15 }
 0x442   : > { %637 = vrot.lane.b32.xlu0 %v2112_v9, %s1920_s16 }
 0x445   : > { %866 = vrot.lane.b32.xlu1 %v2083_v24, %s1918_s29  ;;  %s1852_s29 = sshll.u32 %s1928_s28, 4  ;;  %s1853_s29 = int_to_ptr.vmem [resolvable:$false] %s1852_s29 }
 0x446   : > { %1048 = vrot.lane.b32.xlu0 %v2076_v20, %s1921_s17  ;;  %s1854_s1 = scalar_lea.vmem %s1853_s29, 256 }
 0x449   : > { %860 = vrot.lane.b32.xlu1 %v2083_v24, %s1919_s15  ;;  %s1926_s15 = smov 16  }
 0x44a   : > { %1046 = vrot.lane.b32.xlu0 %v2076_v20, %s1922_s18 }
 0x44e   : > { %1040 = vrot.lane.b32.xlu0 %v2083_v24, %s1921_s17 }
 0x452   : > { %1034 = vrot.lane.b32.xlu0 %v2083_v24, %s1922_s18  ;;  %s1927_s18 = smov 24  }
 0x4b9   : > { %v631_v23 = vpop.xlane.xlu0 %630 }
 0x4ba   : > { %1828 = vrcp.f32 %v631_v23 }
 0x4bd   : > { %v808_v25 = vpop.xlane.xlu1 %807  ;;  %v638_v26 = vpop.permute.xlu0 %637 }
 0x4be   : > { %1830 = vrcp.f32 %v808_v25  ;;  %v644_v27 = vsel %vm642_vm7, %v638_v26, 0 }
 0x4bf   : > { %1675 = vmatpush3.bf16.msra.mxu1 %v644_v27 }
 0x4c0   : > { %1685 = vmatprep.subr.bf16.mxu1 %v1912_v8 }
 0x4c1   : > { %v873_v28 = vpop.permute.xlu1 %872  ;;  %v1049_v29 = vpop.permute.xlu0 %1048 }
 0x4c2   : > { %1694 = vmatmul.mubr.msk.f32.vlgmr.msra.gmra.mrb[2].mxu0 %vm503_vm2, %v873_v28 }
 0x4c3   : > { %1698 = vmatprep.mubr.msk.bf16.mxu0 %vm1913_vm1, %v1912_v8 }
 0x4c4   : > { %v1829_v20 = vpop.eup %1828 }
 0x4c5   : > { %v633_v24 = vmul.f32 %v1829_v20, %v1825_v18  ;;  %v867_v30 = vpop.permute.xlu1 %866  ;;  %v1047_v31 = vpop.permute.xlu0 %1046 }
 0x4c6   : > { %v869_v32 = vsel %vm503_vm2, %v867_v30, 0.0 }
 0x4c7   : > { %870 = vadd.xlane.f32.xlu1 %v869_v32  ;;  %v634_v33 = vpack.c.bf16 %v633_v24, %v633_v24 }
 0x4c8   : > { %v1831_v34 = vpop.eup %1830 }
 0x4c9   : > { %1677 = vmatmul.mubr.msk.bf16.vlgmr.msra.gmra.mrb[8].mxu1 %vm503_vm2, %v634_v33  ;;  %v1041_v36 = vpop.permute.xlu0 %1040  ;;  %v810_v38 = vmul.f32 %v1831_v34, %v1827_v21  ;;  %v861_v40 = vpop.permute.xlu1 %860 }
 0x4ca   : > { %1686 = vmatpush3.bf16.msra.mxu1 %v818_v35  ;;  %v1043_v37 = vsel %vm503_vm2, %v1041_v36, 0.0  ;;  %1687 = vmatprep.mubr.msk.bf16.mxu1 %vm1913_vm1, %v1912_v8  ;;  %v863_v42 = vsel %vm503_vm2, %v861_v40, 0.0 }
 0x4cb   : > { %1044 = vadd.xlane.f32.xlu0 %v1043_v37  ;;  %1702 = vmatprep.subr.mxu1 %v1912_v8  ;;  %v811_v44 = vpack.c.bf16 %v810_v38, %v810_v38 }
 0x4cd   : > { %v1035_v41 = vpop.permute.xlu0 %1034 }
 0x4ce   : > { %v1037_v43 = vsel %vm503_vm2, %v1035_v41, 0.0 }
 0x4cf   : > { %864 = vadd.xlane.f32.xlu0 %v863_v42  ;;  %1038 = vadd.xlane.f32.xlu1 %v1037_v43 }
 0x4d1   : > { %1688 = vmatmul.mubr.msk.bf16.vlgmr.msra.gmra.mrb[12].mxu1 %vm503_vm2, %v811_v44 }
 0x4d2   : > { %1704 = vmatprep.mubr.msk.f32.mxu1 %vm1913_vm1, %v1912_v8 }
 0x4d3   : > { %1703 = vmatpush3.xpose.msk.msra.mxu1 %vm503_vm2, %v1049_v29 }
 0x4d4   : > { %1707 = vmatprep.subr.bf16.mxu1 %v1912_v8 }
 0x4d9   : > { %1705 = vmatmul.mubr.msk.f32.vlgmr.msra.gmra.mrb[6].mxu1 %vm503_vm2, %v1047_v31 }
 0x4da   : > { %1709 = vmatprep.mubr.msk.bf16.mxu1 %vm1913_vm1, %v1912_v8 }
 0x554   : > { %v871_v46 = vpop.xlane.xlu1 %870 }
 0x555   : > { %v954_v48 = vrot.slane %v871_v46, %v2104_v39 }
 0x558   : > { %v1045_v45 = vpop.xlane.xlu0 %1044 }
 0x559   : > { %v1128_v6 = vrot.slane %v1045_v45, %v2104_v39  ;;  %v1806_v45 = vld [vmem:[%s2295_s2] sm:$0xff]  }
 0x55c   : > { %v865_v47 = vpop.xlane.xlu0 %864  ;;  %v1039_v4 = vpop.xlane.xlu1 %1038 }
 0x55d   : > { %v962_v50 = vadd.f32 %v954_v48, %v865_v47  ;;  %v1136_v11 = vadd.f32 %v1128_v6, %v1039_v4 }
 0x595   : > { %v946_v49 = vpop.f32.mrb[2].mxu0 }
 0x596   : > { %v963_v51 = vmul.f32 2.0, %v946_v49  ;;  %v1695_v52 = vpop.f32.mrb[3].mxu0 }
 0x598   : > { %v964_v53 = vsub.f32 %v962_v50, %v963_v51  ;;  %v1807_v50 = vld [vmem:[%s2295_s2 + $0x8] sm:$0xff]  }
 0x59a   : > { %v965_v54 = vmax.f32 %v964_v53, 0.0 }
 0x59c   : > { %v2151_v55 = vpop.f32.mrb[8].mxu1  ;;  %1832 = vrsqrt.f32 %v965_v54  ;;  %vm968_vm8 = vcmp.eq.f32.partialorder %v965_v54, inf  ;;  %v971_v2 = vand.u32 2147483648, %v965_v54  ;;  %vm970_vm9 = vcmp.eq.f32.partialorder %v965_v54, 0.0 }
 0x59d   : > { %v1678_v56 = vpop.f32.mrb[9].mxu1 }
 0x59e   : > { %v683_v57 = vpop.f32.mrb[10].mxu1 }
 0x59f   : > { %v1679_v58 = vpop.f32.mrb[11].mxu1 }
 0x5a4   : > { %v854_v59 = vpop.f32.mrb[12].mxu1 }
 0x5a5   : > { %v1689_v60 = vpop.f32.mrb[13].mxu1 }
 0x5a6   : > { %v1833_v61 = vpop.eup %1832  ;;  %v857_v62 = vpop.f32.mrb[14].mxu1 }
 0x5a7   : > { %v1690_v63 = vpop.f32.mrb[15].mxu1  ;;  %v967_v1 = vmul.f32 %v1833_v61, %v965_v54 }
 0x5a8   : > { %v1604_v63 = vld [vmem:[%s2296_s3] ss:$0 sm:$0xff] }
 0x5a9   : > { %v969_v3 = vsel %vm968_vm8, %v965_v54, %v967_v1 }
 0x5aa   : > { %v972_v5 = vsel %vm970_vm9, %v971_v2, %v969_v3 }
 0x5ab   : > { %v973_v7 = vmul.f32 0.17677669, %v972_v5 }
 0x5ac   : > { %v1120_v10 = vpop.f32.mrb[6].mxu1 }
 0x5ad   : > { %v1137_v12 = vmul.f32 2.0, %v1120_v10  ;;  %v1706_v13 = vpop.f32.mrb[7].mxu1  ;;  %v974_v14 = vsel %vm503_vm2, %v973_v7, -inf }
 0x5ae   : > { %975 = vmax.xlane.f32.xlu0 %v974_v14  ;;  %v1808_v14 = vld [vmem:[%s2301_s8] sm:$0xff]  }
 0x5af   : > { %v1138_v15 = vsub.f32 %v1136_v11, %v1137_v12 }
 0x5b1   : > { %v1139_v16 = vmax.f32 %v1138_v15, 0.0  ;;  %v1810_v15 = vld [vmem:[%s2303_s10] sm:$0xff]  }
 0x5b3   : > { %1834 = vrsqrt.f32 %v1139_v16  ;;  %vm1142_vm10 = vcmp.eq.f32.partialorder %v1139_v16, inf  ;;  %v1145_v19 = vand.u32 2147483648, %v1139_v16  ;;  %vm1144_vm11 = vcmp.eq.f32.partialorder %v1139_v16, 0.0 }
 0x5bd   : > { %v1835_v17 = vpop.eup %1834 }
 0x5be   : > { %v1141_v18 = vmul.f32 %v1835_v17, %v1139_v16  ;;  %v1812_v17 = vld [vmem:[%s2303_s10 + $0x10] sm:$0xff]  }
 0x5c0   : > { %v1143_v21 = vsel %vm1142_vm10, %v1139_v16, %v1141_v18  ;;  %v1811_v16 = vld [vmem:[%s2303_s10 + $0x8] sm:$0xff]  }
 0x5c1   : > { %v1146_v22 = vsel %vm1144_vm11, %v1145_v19, %v1143_v21 }
 0x5c2   : > { %v1147_v23 = vmul.f32 0.17677669, %v1146_v22 }
 0x5c4   : > { %v1148_v39 = vsel %vm503_vm2, %v1147_v23, -inf }
 0x5c5   : > { %1149 = vmax.xlane.f32.xlu1 %v1148_v39 }
 0x63b   : > { %v976_v25 = vpop.xlane.xlu0 %975 }
 0x63c   : > { %v977_v26 = vsub.f32 %v973_v7, %v976_v25  ;;  %v1609_v25 = vld [vmem:[%s2300_s7] ss:$0 sm:$0xff] }
 0x63e   : > { %v978_v27 = vmul.f32 1.442695, %v977_v26 }
 0x640   : > { %1836 = vpow2.f32 %v978_v27 }
 0x64a   : > { %v1837_v28 = vpop.eup %1836 }
 0x64b   : > { %v980_v29 = vsel %vm503_vm2, %v1837_v28, 0.0 }
 0x64c   : > { %981 = vadd.xlane.f32.xlu0 %v980_v29  ;;  %v1813_v29 = vld [vmem:[%s2303_s10 + $0x18] sm:$0xff]  }
 0x652   : > { %v1150_v20 = vpop.xlane.xlu1 %1149 }
 0x653   : > { %v1151_v24 = vsub.f32 %v1147_v23, %v1150_v20  ;;  %v1608_v23 = vld [vmem:[%s2299_s6] ss:$0 sm:$0xff] }
 0x654   : > { %v1814_v20 = vld [vmem:[%s2303_s10 + $0x20] sm:$0xff]  }
 0x655   : > { %v1152_v30 = vmul.f32 1.442695, %v1151_v24  ;;  %v1815_v24 = vld [vmem:[%s2303_s10 + $0x28] sm:$0xff]  }
 0x657   : > { %1838 = vpow2.f32 %v1152_v30  ;;  %v1816_v30 = vld [vmem:[%s2303_s10 + $0x30] sm:$0xff]  }
 0x661   : > { %v1839_v31 = vpop.eup %1838 }
 0x662   : > { %986 = vrot.lane.b32.xlu0 %v2112_v9, %s1923_s19  ;;  %v1154_v32 = vsel %vm503_vm2, %v1839_v31, 0.0 }
 0x663   : > { %1155 = vadd.xlane.f32.xlu1 %v1154_v32  ;;  %v1610_v32 = vld [vmem:[%s2302_s9] ss:$0 sm:$0xff] }
 0x674   : > { %1160 = vrot.lane.b32.xlu1 %v2112_v9, %s1924_s20  ;;  %s402_s20 = sand.u32 1, %s1902_s22  }
 0x678   : > { %1209 = vrot.lane.b32.xlu1 %v854_v59, %s1925_s26  ;;  %s1585_s26 = sshll.u32 %s402_s20, 3 }
 0x679   : > { %s404_s16 = scalar_lea.vmem [#allocation2], %s1585_s26 }
 0x67a   : > { %s1522_s17 = sshll.u32 %s404_s16, 4  ;;  %s2252_s17 = int_to_ptr.vmem [resolvable:$true] %s1522_s17 }
 0x67b   : > { %s1848_s26 = scalar_lea.vmem %s2252_s17, 128  ;;  %p1855_p0 = scmp.lt.s32.totalorder %s2252_s17, %s1853_s29 }
 0x67c   : > { %p1849_p11 = scmp.ne.s32.totalorder %s2252_s17, %s1848_s26  ;;  %p1856_p1 = scmp.lt.s32.totalorder %s1854_s1, %s1848_s26 }
 0x67e   : > { %p1850_p12 = pnand %p1849_p11, %p2032_p5  ;;  %p1857_p2 = por %p1856_p1, %p1855_p0 }
 0x680   : > { %p1851_p13 = pneg %p1850_p12 }
 0x682   : > { %p1858_p3 = pnand %p1857_p2, %p1851_p13 }
 0x6d9   : > { %v982_v33 = vpop.xlane.xlu0 %981 }
 0x6da   : > { %1840 = vrcp.f32 %v982_v33 }
 0x6dd   : > { %v987_v34 = vpop.permute.xlu0 %986 }
 0x6de   : > { %v992_v35 = vsel %vm642_vm7, %v987_v34, 0 }
 0x6df   : > { %1697 = vmatpush3.bf16.msra.mxu0 %v992_v35 }
 0x6e0   : > { %1713 = vmatprep.subr.bf16.mxu0 %v1912_v8 }
 0x6e4   : > { %v1841_v36 = vpop.eup %1840 }
 0x6e5   : > { %v984_v37 = vmul.f32 %v1841_v36, %v1837_v28 }
 0x6e7   : > { %v985_v38 = vpack.c.bf16 %v984_v37, %v984_v37 }
 0x6e9   : > { %1699 = vmatmul.mubr.msk.bf16.vlgmr.msra.gmra.mrb[4].mxu0 %vm503_vm2, %v985_v38 }
 0x6ea   : > { %1717 = vmatprep.mubr.msk.bf16.mxu0 %vm1913_vm1, %v1912_v8  ;;  %1714 = vmatpush3.bf16.msra.mxu0 %v1806_v45 }
 0x6eb   : > { %1715 = vmatprep.subr.bf16.mxu0 %v1912_v8 }
 0x6ee   : > { %1716 = vmatpush3.bf16.msra.mxu0 %v1807_v50 }
 0x6ef   : > { %1729 = vmatprep.subr.bf16.mxu0 %v1912_v8 }
 0x6f0   : > { %v1156_v40 = vpop.xlane.xlu1 %1155 }
 0x6f1   : > { %1842 = vrcp.f32 %v1156_v40 }
 0x6f4   : > { %v1161_v9 = vpop.permute.xlu1 %1160 }
 0x6f5   : > { %v1166_v41 = vsel %vm642_vm7, %v1161_v9, 0 }
 0x6f6   : > { %1708 = vmatpush3.bf16.msra.mxu1 %v1166_v41 }
 0x6f7   : > { %1721 = vmatprep.subr.bf16.mxu1 %v1912_v8 }
 0x6f8   : > { %v1210_v56 = vpop.permute.xlu1 %1209 }
 0x6f9   : > { %v1220_v58 = vsel %vm503_vm2, %v2151_v55, %v1210_v56 }
 0x6fb   : > { %v1843_v42 = vpop.eup %1842 }
 0x6fc   : > { %v1158_v43 = vmul.f32 %v1843_v42, %v1839_v31  ;;  %v1817_v31 = vld [vmem:[%s2303_s10 + $0x38] sm:$0xff]  }
 0x6fe   : > { %v1159_v44 = vpack.c.bf16 %v1158_v43, %v1158_v43  ;;  %v1614_v43 = vld [vmem:[%s2304_s11] ss:$0 sm:$0xff] }
 0x700   : > { %1710 = vmatmul.mubr.msk.bf16.vlgmr.msra.gmra.mrb[16].mxu1 %vm503_vm2, %v1159_v44 }
 0x701   : > { %1725 = vmatprep.mubr.msk.bf16.mxu1 %vm1913_vm1, %v1912_v8  ;;  %1722 = vmatpush3.bf16.msra.mxu1 %v1808_v14 }
 0x702   : > { %1723 = vmatprep.subr.bf16.mxu1 %v1912_v8 }
 0x7bc   : > { %v1028_v46 = vpop.f32.mrb[4].mxu0 }
 0x7bd   : > { %1213 = vrot.lane.b32.xlu0 %v1028_v46, %s1926_s15  ;;  %v1700_v47 = vpop.f32.mrb[5].mxu0  ;;  %s1624_s15 = sshll.u32 %s2015_s25, 7  ;;  %s1509_s25 = scalar_lea.sflag [#allocation3], %s402_s20 }
 0x7be   : > { %v1031_v48 = vpop.f32.mrb[6].mxu0  ;;  %s2250_s0 = scalar_lea.hbm %s2305_s12, %s1624_s15 }
 0x7bf   : > { %v1701_v49 = vpop.f32.mrb[7].mxu0 }
 0x7d3   : > { %v1202_v51 = vpop.f32.mrb[16].mxu1 }
 0x7d4   : > { %1217 = vrot.lane.b32.xlu1 %v1202_v51, %s1927_s18  ;;  %v1711_v52 = vpop.f32.mrb[17].mxu1 }
 0x7d5   : > { %v1205_v53 = vpop.f32.mrb[18].mxu1 }
 0x7d6   : > { %v1712_v54 = vpop.f32.mrb[19].mxu1 }
 0x82f   : > { %v1214_v57 = vpop.permute.xlu0 %1213 }
 0x830   : > { %v1222_v59 = vsel %vm1221_vm12, %v1220_v58, %v1214_v57 }
 0x846   : > { %v1218_v60 = vpop.permute.xlu1 %1217 }
 0x847   : > { %v1224_v61 = vsel %vm1223_vm13, %v1222_v59, %v1218_v60 }
 0x848   : > { %v1225_v62 = vpack.c.bf16 %v1224_v61, %v1224_v61 }
 0x84a   : > { %1718 = vmatmul.mubr.msk.bf16.vlgmr.msra.gmra.mrb[8].mxu0 %vm411_vm0, %v1225_v62 }
 0x84b   : > { %1745 = vmatprep.mubr.msk.bf16.mxu0 %vm1913_vm1, %v1912_v8  ;;  %1730 = vmatpush3.bf16.msra.mxu0 %v1810_v15 }
 0x84c   : > { %1731 = vmatprep.subr.bf16.mxu0 %v1912_v8 }
 0x84f   : > { %1732 = vmatpush3.bf16.msra.mxu0 %v1811_v16 }
 0x850   : > { %1733 = vmatprep.subr.bf16.mxu0 %v1912_v8 }
 0x853   : > { %1734 = vmatpush3.bf16.msra.mxu0 %v1812_v17 }
 0x854   : > { %1735 = vmatprep.subr.bf16.mxu0 %v1912_v8 }
 0x857   : > { %1736 = vmatpush3.bf16.msra.mxu0 %v1813_v29 }
 0x858   : > { %1737 = vmatprep.subr.bf16.mxu0 %v1912_v8 }
 0x85b   : > { %1738 = vmatpush3.bf16.msra.mxu0 %v1814_v20 }
 0x85c   : > { %1739 = vmatprep.subr.bf16.mxu0 %v1912_v8 }
 0x85f   : > { %1740 = vmatpush3.bf16.msra.mxu0 %v1815_v24 }
 0x860   : > { %1741 = vmatprep.subr.bf16.mxu0 %v1912_v8 }
 0x863   : > { %1742 = vmatpush3.bf16.msra.mxu0 %v1816_v30 }
 0x864   : > { %1743 = vmatprep.subr.bf16.mxu0 %v1912_v8 }
 0x867   : > { %1744 = vmatpush3.bf16.msra.mxu0 %v1817_v31 }
 0x91d   : > { %v1286_v1 = vpop.f32.mrb[8].mxu0 }
 0x91e   : > { %v1287_v2 = vadd.f32 %v1604_v63, %v1286_v1  ;;  %v1719_v3 = vpop.f32.mrb[9].mxu0 }
 0x91f   : > { %v1289_v4 = vpop.f32.mrb[10].mxu0 }
 0x920   : > { %v2187_v5 = vadd.f32 %v1287_v2, %v2047_v0  ;;  %v1720_v55 = vpop.f32.mrb[11].mxu0  ;;  %v1809_v0 = vld [vmem:[%s2301_s8 + $0x8] sm:$0xff]  }
 0x921   : > { %1724 = vmatpush3.bf16.msra.mxu1 %v1809_v0 }
 0x922   : > { %v1293_v6 = vsel %vm411_vm0, %v2187_v5, 0.0 }
 0x923   : > { %1294 = vadd.xlane.f32.xlu0 %v1293_v6 }
 0x9b0   : > { %v1295_v7 = vpop.xlane.xlu0 %1294 }
 0x9b1   : > { %v1296_v10 = vmul.f32 0.03125, %v1295_v7 }
 0x9b3   : > { %v1297_v11 = vsub.f32 %v2187_v5, %v1296_v10 }
 0x9b5   : > { %v1298_v12 = vmul.f32 %v1297_v11, %v1297_v11 }
 0x9b7   : > { %v1299_v13 = vsel %vm411_vm0, %v1298_v12, 0.0 }
 0x9b8   : > { %1300 = vadd.xlane.f32.xlu1 %v1299_v13 }
 0xa45   : > { %v1301_v18 = vpop.xlane.xlu1 %1300 }
 0xa46   : > { %v1302_v19 = vmul.f32 0.03125, %v1301_v18 }
 0xa48   : > { %v1303_v21 = vadd.f32 1e-05, %v1302_v19 }
 0xa4a   : > { %1844 = vrsqrt.f32 %v1303_v21 }
 0xa54   : > { %v1845_v22 = vpop.eup %1844 }
 0xa55   : > { %v1305_v39 = vmul.f32 %v1845_v22, %v1297_v11 }
 0xa57   : > { %v1313_v26 = vmul.f32 %v1608_v23, %v1305_v39 }
 0xa59   : > { %v1321_v27 = vadd.f32 %v1609_v25, %v1313_v26 }
 0xa5b   : > { %v1322_v28 = vpack.c.bf16 %v1321_v27, %v1321_v27 }
 0xa5d   : > { %1726 = vmatmul.mubr.msk.bf16.vlgmr.msra.gmra.mrb[20].mxu1 %vm411_vm0, %v1322_v28 }
 0xb30   : > { %v1383_v33 = vpop.f32.mrb[20].mxu1 }
 0xb31   : > { %v1384_v34 = vadd.f32 %v1610_v32, %v1383_v33  ;;  %v1727_v35 = vpop.f32.mrb[21].mxu1 }
 0xb32   : > { %v1386_v36 = vpop.f32.mrb[22].mxu1 }
 0xb33   : > { %v1390_v37 = vmul.f32 0.70710677, %v1384_v34  ;;  %v1728_v38 = vpop.f32.mrb[23].mxu1  ;;  %v1389_v8 = vmul.f32 0.5, %v1384_v34 }
 0xb35   : > { %1846 = verf.f32 %v1390_v37 }
 0xb3f   : > { %v1847_v40 = vpop.eup %1846 }
 0xb40   : > { %v1392_v9 = vadd.f32 1.0, %v1847_v40 }
 0xb42   : > { %v1393_v41 = vmul.f32 %v1392_v9, %v1389_v8 }
 0xb44   : > { %v1394_v42 = vpack.c.bf16 %v1393_v41, %v1393_v41 }
 0xb46   : > { %1746 = vmatmul.mubr.bf16.vlgmr.msra.gmra.mrb[12].mxu0 %v1394_v42 }
 0xc19   : > { %v1500_v44 = vpop.f32.mrb[12].mxu0 }
 0xc1a   : > { %v1501_v45 = vadd.f32 %v1614_v43, %v1500_v44  ;;  %v1747_v46 = vpop.f32.mrb[13].mxu0 }
 0xc1b   : > { %v1503_v47 = vpop.f32.mrb[14].mxu0 }
 0xc1c   : > { %v1506_v48 = vadd.f32 %v1501_v45, %v2187_v5  ;;  %v1748_v49 = vpop.f32.mrb[15].mxu0 }
 0xc1e   : > { %1507 = vst.msk [vmem:[%s404_s16] sm:$0xff] %vm411_vm0, %v1506_v48 }
 0xc1f   : > { %1861 = shalt.err (!%p1858_p3)
}
 0xc20   : > { %s1862_s20 = scalar_lea.hbm %s2250_s0, 128  ;;  %s1866_s18 = scalar_lea.hbm %s2305_s12, 256 }
 0xc21   : > { %p1863_p4 = scmp.ne.s32.totalorder %s2250_s0, %s1862_s20  ;;  %p1867_p9 = scmp.lt.u32.totalorder %s2250_s0, %s2305_s12 }
 0xc22   : > { %p1868_p10 = scmp.lt.u32.totalorder %s1866_s18, %s1862_s20  ;;  %p1870_p12 = scmp.lt.u32.totalorder %s1862_s20, %s2250_s0 }
 0xc23   : > { %p1864_p7 = pnand %p1863_p4, %p2032_p5 }
 0xc24   : > { %p1869_p11 = por %p1868_p10, %p1867_p9 }
 0xc25   : > { %p1865_p8 = pneg %p1864_p7 }
 0xc26   : > { %p1871_p13 = por %p1870_p12, %p1869_p11 }
 0xc28   : > { %p1872_p0 = pnand %p1871_p13, %p1865_p8 }
 0xc2a   : > { %1875 = shalt.err (!%p1872_p0)
}
 0xc2b   : > { %1749 = dma.vmem_to_hbm [thread:$0]  (%p2032_p5), %s2252_s17, 128, %s2250_s0, %s1509_s25  }
 0xc2c PF: > { %p1755_p1 = scmp.ge.s32.totalorder %s1910_s24, 2  ;;  %s1534_s1 = sand.u32 1, %s1898_s21  }
 0xc2d   : > { %s1535_s26 = scalar_lea.sflag [#allocation3], %s1534_s1 }
 0xc2e   : > { %p1752_p2 = pnand %p1755_p1, %p2036_p6 }
 0xc30   : > { %1893 = dma.done.wait (!%p1752_p2), %s1535_s26, 128  }
 0xc31   : > { %1895 = vsyncadd (!%p1752_p2), %s1535_s26, 4294967168  ;;  %p22_p3 = scmp.ge.s32.totalorder %s2019_s27, 4   ;;  %s2312_s21 = smov %s1902_s22 }
 0xc32   : > { %s2313_s22 = smov %s1906_s23  ;;  %s2314_s23 = smov %s2030_s30 }
 0xc33   : > { %s2315_s24 = smov %s2019_s27  ;;  %24 = sbr.rel (!%p22_p3) target bundleno = 6 (0x6), region = 103 }
 0xc3a   :  { %1540 = vsyncpa [#allocation3], 1 }
 0xc3b   :  { %1542 = vsyncpa [#allocation3 + $0x1], 1 }

// kernel: _dencoder_forward.1
= control target key start
LH: loop header
LB: loop body
LE: loop exit
PB: predicated region body
PF: predicated region fallthrough
CT: control target
= control target key end

     0   :  { %s2293_s0 = inlined_call_operand.vmem [shape: f32[16,32], index: 0, kind: input, shape index: {}]   ;;  %s2294_s1 = inlined_call_operand.vmem [shape: bf16[32,96], index: 1, kind: input, shape index: {}]   ;;  %s2295_s2 = inlined_call_operand.vmem [shape: bf16[32,32], index: 2, kind: input, shape index: {}]   ;;  %s2296_s3 = inlined_call_operand.vmem [shape: f32[1,32], index: 3, kind: input, shape index: {}]   ;;  %s2297_s4 = inlined_call_operand.vmem [shape: f32[1,32], index: 4, kind: input, shape index: {}]   ;;  %s2298_s5 = inlined_call_operand.vmem [shape: f32[1,32], index: 5, kind: input, shape index: {}]   ;;  %s2299_s6 = inlined_call_operand.vmem [shape: f32[1,32], index: 6, kind: input, shape index: {}]   ;;  %s2300_s7 = inlined_call_operand.vmem [shape: f32[1,32], index: 7, kind: input, shape index: {}]   ;;  %s2301_s8 = inlined_call_operand.vmem [shape: bf16[32,128], index: 8, kind: input, shape index: {}]   ;;  %s2302_s9 = inlined_call_operand.vmem [shape: f32[1,128], index: 9, kind: input, shape index: {}]   ;;  %s2303_s10 = inlined_call_operand.vmem [shape: bf16[128,32], index: 10, kind: input, shape index: {}]   ;;  %s2304_s11 = inlined_call_operand.vmem [shape: f32[1,32], index: 11, kind: input, shape index: {}]   ;;  %s2305_s12 = inlined_call_operand.hbm [shape: f32[16,32], index: 12, kind: output, shape index: {}]  }
   0x1   :  { %2306 = sst [smem:[#allocation5_spill]] %s2293_s0 }
   0x2   :  { %2307 = sst [smem:[#allocation6_spill]] %s2294_s1 }
   0x3   :  { %17 = vsyncpa [#allocation3], 0 }
   0x4   :  { %19 = vsyncpa [#allocation3 + $0x1], 0  ;;  %s1994_s21 = smov 0   ;;  %s1996_s22 = smov 0  }
   0x5   :  { %s1998_s23 = smov 0   ;;  %s2000_s24 = smov 0  }
   0x6 LB: > { %s2015_s25 = sadd.s32 4294967295, %s1910_s24   ;;  %s1581_s26 = sadd.s32 4294967294, %s1910_s24   ;;  %s1910_s24 = sphi %s2000_s24, %s2315_s24   ;;  %s1906_s23 = sphi %s1998_s23, %s2314_s23   ;;  %s1902_s22 = sphi %s1996_s22, %s2313_s22   ;;  %s1898_s21 = sphi %s1994_s21, %s2312_s21  }
   0x7   : > { %s2019_s27 = sadd.s32 1, %s1910_s24   ;;  %s289_s28 = sadd.s32 1, %s1906_s23 }
   0x8   : > { %s286_s29 = ssub.s32 %s1910_s24, %s2019_s27  ;;  %p299_p0 = scmp.ne.s32.totalorder %s1906_s23, %s1902_s22 }
   0x9   : > { %p287_p1 = scmp.eq.s32.totalorder %s286_s29, 0  ;;  %p300_p2 = scmp.eq.s32.totalorder %s2015_s25, 1 }
   0xa   : > { %p305_p3 = scmp.ne.s32.totalorder %s1902_s22, %s1898_s21  ;;  %p306_p4 = scmp.eq.s32.totalorder %s1581_s26, 1 }
   0xb   : > { %s2030_s30 = scalar_select %p287_p1, %s1906_s23, %s289_s28  }
   0xc   : > { %p2032_p5 = por %p300_p2, %p299_p0  ;;  %p2036_p6 = por %p306_p4, %p305_p3 }
   0xd   : > { %p1584_p7 = scmp.ge.s32.totalorder %s1910_s24, 1  ;;  %p364_p8 = scmp.lt.s32.totalorder %s1910_s24, 3 }
   0xf   : > { %p365_p9 = pnand %p1584_p7, %p364_p8 }
  0x10   : > { %p405_p10 = scmp.lt.s32.totalorder (!%p365_p9), %s2015_s25, 1  ;;  %vm411_vm0 = vcmask (!%p365_p9), 261120   ;;  %s2310_s0 = sld [smem:[#allocation5_spill]] (!%p365_p9)  ;;  %v1912_v8 = vmov (!%p365_p9), 0.0   ;;  %vm1913_vm1 = vmmov (!%p365_p9), 0   ;;  %vm503_vm2 = vcmask (!%p365_p9), 64512  }
  0x11   : > { %368 = sbr.rel (%p365_p9) target bundleno = 3116 (0xc2c), region = 68  ;;  %s2311_s1 = sld [smem:[#allocation6_spill]] (!%p365_p9)  ;;  %1661 = vmatprep.subr.bf16.mxu1 (!%p365_p9), %v1912_v8  ;;  %1665 = vmatprep.mubr.msk.bf16.mxu1 (!%p365_p9), %vm1913_vm1, %v1912_v8  ;;  %v1587_v14 = vld [vmem:[%s2297_s4] ss:$0 sm:$0xff] (!%p365_p9)  ;;  %v592_v35 = vlaneseq (!%p365_p9)  ;;  %vm642_vm7 = vcmask (!%p365_p9), 1043456   ;;  %vm1221_vm12 = vcmask (!%p365_p9), 130048  }
  0x12   : > { %1680 = vmatprep.subr.mxu0 (!%p365_p9), %v1912_v8  ;;  %1682 = vmatprep.mubr.msk.f32.mxu0 (!%p365_p9), %vm1913_vm1, %v1912_v8  ;;  %v1588_v16 = vld [vmem:[%s2298_s5] ss:$0 sm:$0xff] (!%p365_p9)  ;;  %s1915_s20 = smov (!%p365_p9), 96   ;;  %s1916_s26 = smov (!%p365_p9), 88   ;;  %vm1223_vm13 = vcmask (!%p365_p9), 195584  }
  0x13   : > { %v593_v36 = vand.u32 (!%p365_p9), 127, %v592_v35  ;;  %v595_v37 = vshrl.u32 (!%p365_p9), %v592_v35, 7  ;;  %s1917_s28 = smov (!%p365_p9), 56   ;;  %s1918_s29 = smov (!%p365_p9), 80  }
  0x14   : > { %s1921_s17 = smov (!%p365_p9), 72   ;;  %s1922_s18 = smov (!%p365_p9), 104  }
  0x15   : > { %v2104_v39 = vsub.s32 (!%p365_p9), %v593_v36, %v595_v37 }
  0x17   : > { %v1804_v7 = vld [vmem:[%s2311_s1] sm:$0xff] (!%p365_p9)   ;;  %v1805_v9 = vld [vmem:[%s2311_s1 + $0x8] sm:$0xff] (!%p365_p9)  }
  0x18   : > { %s406_s15 = scalar_select %p405_p10, %s2015_s25, 1  ;;  %1662 = vmatpush3.bf16.msra.mxu1 %v1804_v7 }
  0x19   : > { %1663 = vmatprep.subr.bf16.mxu1 %v1912_v8 }
  0x1a   : > { %s1586_s16 = sshll.u32 %s406_s15, 3  ;;  %s1919_s15 = smov 112  }
  0x1b   : > { %s408_s19 = scalar_lea.vmem %s2310_s0, %s1586_s16  ;;  %s1920_s16 = smov 64  }
  0x1c   : > { %v2047_v0 = vld [vmem:[%s408_s19] sm:$0xff]  ;;  %1664 = vmatpush3.bf16.msra.mxu1 %v1805_v9  ;;  %s1914_s19 = smov 120  }
  0x1d   : > { %v412_v1 = vsel %vm411_vm0, %v2047_v0, 0.0  ;;  %1669 = vmatprep.subr.mxu1 %v1912_v8 }
  0x1e   : > { %413 = vadd.xlane.f32.xlu0 %v412_v1 }
  0xab   : > { %v414_v2 = vpop.xlane.xlu0 %413 }
  0xac   : > { %v416_v3 = vmul.f32 0.03125, %v414_v2 }
  0xae   : > { %v417_v4 = vsub.f32 %v2047_v0, %v416_v3 }
  0xb0   : > { %v418_v5 = vmul.f32 %v417_v4, %v417_v4 }
  0xb2   : > { %v419_v6 = vsel %vm411_vm0, %v418_v5, 0.0 }
  0xb3   : > { %420 = vadd.xlane.f32.xlu0 %v419_v6 }
 0x140   : > { %v421_v10 = vpop.xlane.xlu0 %420 }
 0x141   : > { %v422_v11 = vmul.f32 0.03125, %v421_v10 }
 0x143   : > { %v423_v12 = vadd.f32 1e-05, %v422_v11 }
 0x145   : > { %1818 = vrsqrt.f32 %v423_v12 }
 0x14f   : > { %v1819_v13 = vpop.eup %1818 }
 0x150   : > { %v425_v15 = vmul.f32 %v1819_v13, %v417_v4 }
 0x152   : > { %v433_v17 = vmul.f32 %v1587_v14, %v425_v15 }
 0x154   : > { %v441_v18 = vadd.f32 %v1588_v16, %v433_v17 }
 0x156   : > { %v442_v19 = vpack.c.bf16 %v441_v18, %v441_v18 }
 0x158   : > { %1666 = vmatmul.mubr.msk.bf16.vlgmr.msra.gmra.mrb[0].mxu1 %vm411_vm0, %v442_v19 }
 0x159   : > { %1671 = vmatprep.mubr.msk.f32.mxu1 %vm1913_vm1, %v1912_v8 }
 0x22b   : > { %v2076_v20 = vpop.f32.mrb[0].mxu1 }
 0x22c   : > { %698 = vrot.lane.b32.xlu0 %v2076_v20, %s1914_s19  ;;  %515 = vrot.lane.b32.xlu1 %v2076_v20, %s1915_s20  ;;  %v1667_v21 = vpop.f32.mrb[1].mxu1  ;;  %v2083_v24 = vmul.f32 %v2076_v20, %v2076_v20  ;;  %v2112_v9 = vpack.c.bf16 %v2076_v20, %v2076_v20 }
 0x22d   : > { %v499_v22 = vpop.f32.mrb[2].mxu1 }
 0x22e   : > { %v1668_v23 = vpop.f32.mrb[3].mxu1  ;;  %v504_v25 = vsel %vm503_vm2, %v2083_v24, 0.0 }
 0x230   : > { %700 = vrot.lane.b32.xlu1 %v2076_v20, %s1916_s26 }
 0x234   : > { %508 = vrot.lane.b32.xlu1 %v2083_v24, %s1915_s20  ;;  %s1924_s20 = smov 40  }
 0x238   : > { %692 = vrot.lane.b32.xlu1 %v2083_v24, %s1916_s26  ;;  %s1925_s26 = smov 8  }
 0x23c   : > { %686 = vrot.lane.b32.xlu1 %v2083_v24, %s1914_s19  ;;  %s1923_s19 = smov 48  }
 0x24b   : > { %505 = vadd.xlane.f32.xlu0 %v504_v25 }
 0x29e   : > { %v516_v26 = vpop.permute.xlu1 %515  ;;  %v699_v28 = vpop.permute.xlu0 %698 }
 0x29f   : > { %1670 = vmatpush3.xpose.msk.msra.mxu1 %vm503_vm2, %v516_v26 }
 0x2a0   : > { %1674 = vmatprep.subr.bf16.mxu1 %v1912_v8 }
 0x2a2   : > { %1672 = vmatmul.mubr.msk.f32.vlgmr.msra.gmra.mrb[4].mxu1 %vm503_vm2, %v2076_v20  ;;  %v701_v27 = vpop.permute.xlu1 %700 }
 0x2a3   : > { %1681 = vmatpush3.xpose.msk.msra.mxu0 %vm503_vm2, %v701_v27  ;;  %1676 = vmatprep.mubr.msk.bf16.mxu1 %vm1913_vm1, %v1912_v8 }
 0x2a4   : > { %1691 = vmatprep.subr.mxu0 %v1912_v8 }
 0x2a6   : > { %1683 = vmatmul.mubr.msk.f32.vlgmr.msra.gmra.mrb[0].mxu0 %vm503_vm2, %v699_v28  ;;  %v509_v29 = vpop.permute.xlu1 %508 }
 0x2a7   : > { %v511_v30 = vsel %vm503_vm2, %v509_v29, 0.0  ;;  %1693 = vmatprep.mubr.msk.f32.mxu0 %vm1913_vm1, %v1912_v8 }
 0x2a8   : > { %512 = vadd.xlane.f32.xlu1 %v511_v30 }
 0x2aa   : > { %v693_v31 = vpop.permute.xlu1 %692 }
 0x2ab   : > { %v695_v32 = vsel %vm503_vm2, %v693_v31, 0.0 }
 0x2ac   : > { %696 = vadd.xlane.f32.xlu1 %v695_v32 }
 0x2ae   : > { %v687_v33 = vpop.permute.xlu1 %686 }
 0x2af   : > { %v689_v34 = vsel %vm503_vm2, %v687_v33, 0.0 }
 0x2b0   : > { %690 = vadd.xlane.f32.xlu1 %v689_v34 }
 0x2d8   : > { %v506_v42 = vpop.xlane.xlu0 %505 }
 0x335   : > { %v513_v38 = vpop.xlane.xlu1 %512 }
 0x336   : > { %v597_v41 = vrot.slane %v513_v38, %v2104_v39 }
 0x338   : > { %v611_v44 = vadd.f32 %v597_v41, %v506_v42 }
 0x339   : > { %v697_v40 = vpop.xlane.xlu1 %696 }
 0x33a   : > { %v780_v48 = vrot.slane %v697_v40, %v2104_v39 }
 0x33d   : > { %v691_v47 = vpop.xlane.xlu1 %690 }
 0x33e   : > { %v788_v51 = vadd.f32 %v780_v48, %v691_v47 }
 0x375   : > { %v587_v43 = vpop.f32.mrb[4].mxu1 }
 0x376   : > { %v612_v45 = vmul.f32 2.0, %v587_v43  ;;  %v1673_v46 = vpop.f32.mrb[5].mxu1 }
 0x378   : > { %v613_v49 = vsub.f32 %v611_v44, %v612_v45 }
 0x379   : > { %v772_v50 = vpop.f32.mrb[0].mxu0 }
 0x37a   : > { %v614_v52 = vmax.f32 %v613_v49, 0.0  ;;  %v789_v53 = vmul.f32 2.0, %v772_v50  ;;  %v1684_v54 = vpop.f32.mrb[1].mxu0 }
 0x37c   : > { %v790_v55 = vsub.f32 %v788_v51, %v789_v53  ;;  %1820 = vrsqrt.f32 %v614_v52  ;;  %vm617_vm3 = vcmp.eq.f32.partialorder %v614_v52, inf  ;;  %v620_v59 = vand.u32 2147483648, %v614_v52 }
 0x37d   : > { %vm619_vm4 = vcmp.eq.f32.partialorder %v614_v52, 0.0 }
 0x37e   : > { %v791_v56 = vmax.f32 %v790_v55, 0.0 }
 0x380   : > { %1822 = vrsqrt.f32 %v791_v56  ;;  %vm794_vm5 = vcmp.eq.f32.partialorder %v791_v56, inf  ;;  %v797_v2 = vand.u32 2147483648, %v791_v56  ;;  %vm796_vm6 = vcmp.eq.f32.partialorder %v791_v56, 0.0 }
 0x386   : > { %v1821_v57 = vpop.eup %1820 }
 0x387   : > { %v616_v58 = vmul.f32 %v1821_v57, %v614_v52 }
 0x389   : > { %v618_v60 = vsel %vm617_vm3, %v614_v52, %v616_v58 }
 0x38a   : > { %v1823_v61 = vpop.eup %1822  ;;  %v621_v62 = vsel %vm619_vm4, %v620_v59, %v618_v60 }
 0x38b   : > { %v622_v63 = vmul.f32 0.17677669, %v621_v62  ;;  %v793_v1 = vmul.f32 %v1823_v61, %v791_v56 }
 0x38d   : > { %v623_v3 = vsel %vm503_vm2, %v622_v63, -inf  ;;  %v795_v4 = vsel %vm794_vm5, %v791_v56, %v793_v1 }
 0x38e   : > { %624 = vmax.xlane.f32.xlu0 %v623_v3  ;;  %v798_v5 = vsel %vm796_vm6, %v797_v2, %v795_v4 }
 0x38f   : > { %v799_v6 = vmul.f32 0.17677669, %v798_v5 }
 0x391   : > { %v800_v7 = vsel %vm503_vm2, %v799_v6, -inf }
 0x392   : > { %801 = vmax.xlane.f32.xlu1 %v800_v7 }
 0x3a3   : > { %812 = vrot.lane.b32.xlu1 %v2112_v9, %s1917_s28  ;;  %s1928_s28 = smov [#allocation2]  }
 0x3a7   : > { %874 = vrot.lane.b32.xlu1 %v2076_v20, %s1918_s29 }
 0x41b   : > { %v625_v10 = vpop.xlane.xlu0 %624 }
 0x41c   : > { %v626_v11 = vsub.f32 %v622_v63, %v625_v10 }
 0x41e   : > { %v627_v12 = vmul.f32 1.442695, %v626_v11 }
 0x41f   : > { %v802_v13 = vpop.xlane.xlu1 %801 }
 0x420   : > { %1824 = vpow2.f32 %v627_v12  ;;  %v803_v14 = vsub.f32 %v799_v6, %v802_v13 }
 0x422   : > { %v804_v15 = vmul.f32 1.442695, %v803_v14 }
 0x423   : > { %v813_v16 = vpop.permute.xlu1 %812 }
 0x424   : > { %1826 = vpow2.f32 %v804_v15  ;;  %v818_v35 = vsel %vm642_vm7, %v813_v16, 0 }
 0x427   : > { %v875_v17 = vpop.permute.xlu1 %874 }
 0x428   : > { %1692 = vmatpush3.xpose.msk.msra.mxu0 %vm503_vm2, %v875_v17 }
 0x429   : > { %1696 = vmatprep.subr.bf16.mxu0 %v1912_v8 }
 0x42a   : > { %v1825_v18 = vpop.eup %1824 }
 0x42b   : > { %v629_v19 = vsel %vm503_vm2, %v1825_v18, 0.0 }
 0x42c   : > { %630 = vadd.xlane.f32.xlu0 %v629_v19 }
 0x42e   : > { %v1827_v21 = vpop.eup %1826 }
 0x42f   : > { %v806_v22 = vsel %vm503_vm2, %v1827_v21, 0.0 }
 0x430   : > { %807 = vadd.xlane.f32.xlu1 %v806_v22 }
 0x441   : > { %872 = vrot.lane.b32.xlu1 %v2076_v20, %s1919_s15 }
 0x442   : > { %637 = vrot.lane.b32.xlu0 %v2112_v9, %s1920_s16 }
 0x445   : > { %866 = vrot.lane.b32.xlu1 %v2083_v24, %s1918_s29  ;;  %s1852_s29 = sshll.u32 %s1928_s28, 4  ;;  %s1853_s29 = int_to_ptr.vmem [resolvable:$false] %s1852_s29 }
 0x446   : > { %1048 = vrot.lane.b32.xlu0 %v2076_v20, %s1921_s17  ;;  %s1854_s1 = scalar_lea.vmem %s1853_s29, 256 }
 0x449   : > { %860 = vrot.lane.b32.xlu1 %v2083_v24, %s1919_s15  ;;  %s1926_s15 = smov 16  }
 0x44a   : > { %1046 = vrot.lane.b32.xlu0 %v2076_v20, %s1922_s18 }
 0x44e   : > { %1040 = vrot.lane.b32.xlu0 %v2083_v24, %s1921_s17 }
 0x452   : > { %1034 = vrot.lane.b32.xlu0 %v2083_v24, %s1922_s18  ;;  %s1927_s18 = smov 24  }
 0x4b9   : > { %v631_v23 = vpop.xlane.xlu0 %630 }
 0x4ba   : > { %1828 = vrcp.f32 %v631_v23 }
 0x4bd   : > { %v808_v25 = vpop.xlane.xlu1 %807  ;;  %v638_v26 = vpop.permute.xlu0 %637 }
 0x4be   : > { %1830 = vrcp.f32 %v808_v25  ;;  %v644_v27 = vsel %vm642_vm7, %v638_v26, 0 }
 0x4bf   : > { %1675 = vmatpush3.bf16.msra.mxu1 %v644_v27 }
 0x4c0   : > { %1685 = vmatprep.subr.bf16.mxu1 %v1912_v8 }
 0x4c1   : > { %v873_v28 = vpop.permute.xlu1 %872  ;;  %v1049_v29 = vpop.permute.xlu0 %1048 }
 0x4c2   : > { %1694 = vmatmul.mubr.msk.f32.vlgmr.msra.gmra.mrb[2].mxu0 %vm503_vm2, %v873_v28 }
 0x4c3   : > { %1698 = vmatprep.mubr.msk.bf16.mxu0 %vm1913_vm1, %v1912_v8 }
 0x4c4   : > { %v1829_v20 = vpop.eup %1828 }
 0x4c5   : > { %v633_v24 = vmul.f32 %v1829_v20, %v1825_v18  ;;  %v867_v30 = vpop.permute.xlu1 %866  ;;  %v1047_v31 = vpop.permute.xlu0 %1046 }
 0x4c6   : > { %v869_v32 = vsel %vm503_vm2, %v867_v30, 0.0 }
 0x4c7   : > { %870 = vadd.xlane.f32.xlu1 %v869_v32  ;;  %v634_v33 = vpack.c.bf16 %v633_v24, %v633_v24 }
 0x4c8   : > { %v1831_v34 = vpop.eup %1830 }
 0x4c9   : > { %1677 = vmatmul.mubr.msk.bf16.vlgmr.msra.gmra.mrb[8].mxu1 %vm503_vm2, %v634_v33  ;;  %v1041_v36 = vpop.permute.xlu0 %1040  ;;  %v810_v38 = vmul.f32 %v1831_v34, %v1827_v21  ;;  %v861_v40 = vpop.permute.xlu1 %860 }
 0x4ca   : > { %1686 = vmatpush3.bf16.msra.mxu1 %v818_v35  ;;  %v1043_v37 = vsel %vm503_vm2, %v1041_v36, 0.0  ;;  %1687 = vmatprep.mubr.msk.bf16.mxu1 %vm1913_vm1, %v1912_v8  ;;  %v863_v42 = vsel %vm503_vm2, %v861_v40, 0.0 }
 0x4cb   : > { %1044 = vadd.xlane.f32.xlu0 %v1043_v37  ;;  %1702 = vmatprep.subr.mxu1 %v1912_v8  ;;  %v811_v44 = vpack.c.bf16 %v810_v38, %v810_v38 }
 0x4cd   : > { %v1035_v41 = vpop.permute.xlu0 %1034 }
 0x4ce   : > { %v1037_v43 = vsel %vm503_vm2, %v1035_v41, 0.0 }
 0x4cf   : > { %864 = vadd.xlane.f32.xlu0 %v863_v42  ;;  %1038 = vadd.xlane.f32.xlu1 %v1037_v43 }
 0x4d1   : > { %1688 = vmatmul.mubr.msk.bf16.vlgmr.msra.gmra.mrb[12].mxu1 %vm503_vm2, %v811_v44 }
 0x4d2   : > { %1704 = vmatprep.mubr.msk.f32.mxu1 %vm1913_vm1, %v1912_v8 }
 0x4d3   : > { %1703 = vmatpush3.xpose.msk.msra.mxu1 %vm503_vm2, %v1049_v29 }
 0x4d4   : > { %1707 = vmatprep.subr.bf16.mxu1 %v1912_v8 }
 0x4d9   : > { %1705 = vmatmul.mubr.msk.f32.vlgmr.msra.gmra.mrb[6].mxu1 %vm503_vm2, %v1047_v31 }
 0x4da   : > { %1709 = vmatprep.mubr.msk.bf16.mxu1 %vm1913_vm1, %v1912_v8 }
 0x554   : > { %v871_v46 = vpop.xlane.xlu1 %870 }
 0x555   : > { %v954_v48 = vrot.slane %v871_v46, %v2104_v39 }
 0x558   : > { %v1045_v45 = vpop.xlane.xlu0 %1044 }
 0x559   : > { %v1128_v6 = vrot.slane %v1045_v45, %v2104_v39  ;;  %v1806_v45 = vld [vmem:[%s2295_s2] sm:$0xff]  }
 0x55c   : > { %v865_v47 = vpop.xlane.xlu0 %864  ;;  %v1039_v4 = vpop.xlane.xlu1 %1038 }
 0x55d   : > { %v962_v50 = vadd.f32 %v954_v48, %v865_v47  ;;  %v1136_v11 = vadd.f32 %v1128_v6, %v1039_v4 }
 0x595   : > { %v946_v49 = vpop.f32.mrb[2].mxu0 }
 0x596   : > { %v963_v51 = vmul.f32 2.0, %v946_v49  ;;  %v1695_v52 = vpop.f32.mrb[3].mxu0 }
 0x598   : > { %v964_v53 = vsub.f32 %v962_v50, %v963_v51  ;;  %v1807_v50 = vld [vmem:[%s2295_s2 + $0x8] sm:$0xff]  }
 0x59a   : > { %v965_v54 = vmax.f32 %v964_v53, 0.0 }
 0x59c   : > { %v2151_v55 = vpop.f32.mrb[8].mxu1  ;;  %1832 = vrsqrt.f32 %v965_v54  ;;  %vm968_vm8 = vcmp.eq.f32.partialorder %v965_v54, inf  ;;  %v971_v2 = vand.u32 2147483648, %v965_v54  ;;  %vm970_vm9 = vcmp.eq.f32.partialorder %v965_v54, 0.0 }
 0x59d   : > { %v1678_v56 = vpop.f32.mrb[9].mxu1 }
 0x59e   : > { %v683_v57 = vpop.f32.mrb[10].mxu1 }
 0x59f   : > { %v1679_v58 = vpop.f32.mrb[11].mxu1 }
 0x5a4   : > { %v854_v59 = vpop.f32.mrb[12].mxu1 }
 0x5a5   : > { %v1689_v60 = vpop.f32.mrb[13].mxu1 }
 0x5a6   : > { %v1833_v61 = vpop.eup %1832  ;;  %v857_v62 = vpop.f32.mrb[14].mxu1 }
 0x5a7   : > { %v1690_v63 = vpop.f32.mrb[15].mxu1  ;;  %v967_v1 = vmul.f32 %v1833_v61, %v965_v54 }
 0x5a8   : > { %v1604_v63 = vld [vmem:[%s2296_s3] ss:$0 sm:$0xff] }
 0x5a9   : > { %v969_v3 = vsel %vm968_vm8, %v965_v54, %v967_v1 }
 0x5aa   : > { %v972_v5 = vsel %vm970_vm9, %v971_v2, %v969_v3 }
 0x5ab   : > { %v973_v7 = vmul.f32 0.17677669, %v972_v5 }
 0x5ac   : > { %v1120_v10 = vpop.f32.mrb[6].mxu1 }
 0x5ad   : > { %v1137_v12 = vmul.f32 2.0, %v1120_v10  ;;  %v1706_v13 = vpop.f32.mrb[7].mxu1  ;;  %v974_v14 = vsel %vm503_vm2, %v973_v7, -inf }
 0x5ae   : > { %975 = vmax.xlane.f32.xlu0 %v974_v14  ;;  %v1808_v14 = vld [vmem:[%s2301_s8] sm:$0xff]  }
 0x5af   : > { %v1138_v15 = vsub.f32 %v1136_v11, %v1137_v12 }
 0x5b1   : > { %v1139_v16 = vmax.f32 %v1138_v15, 0.0  ;;  %v1810_v15 = vld [vmem:[%s2303_s10] sm:$0xff]  }
 0x5b3   : > { %1834 = vrsqrt.f32 %v1139_v16  ;;  %vm1142_vm10 = vcmp.eq.f32.partialorder %v1139_v16, inf  ;;  %v1145_v19 = vand.u32 2147483648, %v1139_v16  ;;  %vm1144_vm11 = vcmp.eq.f32.partialorder %v1139_v16, 0.0 }
 0x5bd   : > { %v1835_v17 = vpop.eup %1834 }
 0x5be   : > { %v1141_v18 = vmul.f32 %v1835_v17, %v1139_v16  ;;  %v1812_v17 = vld [vmem:[%s2303_s10 + $0x10] sm:$0xff]  }
 0x5c0   : > { %v1143_v21 = vsel %vm1142_vm10, %v1139_v16, %v1141_v18  ;;  %v1811_v16 = vld [vmem:[%s2303_s10 + $0x8] sm:$0xff]  }
 0x5c1   : > { %v1146_v22 = vsel %vm1144_vm11, %v1145_v19, %v1143_v21 }
 0x5c2   : > { %v1147_v23 = vmul.f32 0.17677669, %v1146_v22 }
 0x5c4   : > { %v1148_v39 = vsel %vm503_vm2, %v1147_v23, -inf }
 0x5c5   : > { %1149 = vmax.xlane.f32.xlu1 %v1148_v39 }
 0x63b   : > { %v976_v25 = vpop.xlane.xlu0 %975 }
 0x63c   : > { %v977_v26 = vsub.f32 %v973_v7, %v976_v25  ;;  %v1609_v25 = vld [vmem:[%s2300_s7] ss:$0 sm:$0xff] }
 0x63e   : > { %v978_v27 = vmul.f32 1.442695, %v977_v26 }
 0x640   : > { %1836 = vpow2.f32 %v978_v27 }
 0x64a   : > { %v1837_v28 = vpop.eup %1836 }
 0x64b   : > { %v980_v29 = vsel %vm503_vm2, %v1837_v28, 0.0 }
 0x64c   : > { %981 = vadd.xlane.f32.xlu0 %v980_v29  ;;  %v1813_v29 = vld [vmem:[%s2303_s10 + $0x18] sm:$0xff]  }
 0x652   : > { %v1150_v20 = vpop.xlane.xlu1 %1149 }
 0x653   : > { %v1151_v24 = vsub.f32 %v1147_v23, %v1150_v20  ;;  %v1608_v23 = vld [vmem:[%s2299_s6] ss:$0 sm:$0xff] }
 0x654   : > { %v1814_v20 = vld [vmem:[%s2303_s10 + $0x20] sm:$0xff]  }
 0x655   : > { %v1152_v30 = vmul.f32 1.442695, %v1151_v24  ;;  %v1815_v24 = vld [vmem:[%s2303_s10 + $0x28] sm:$0xff]  }
 0x657   : > { %1838 = vpow2.f32 %v1152_v30  ;;  %v1816_v30 = vld [vmem:[%s2303_s10 + $0x30] sm:$0xff]  }
 0x661   : > { %v1839_v31 = vpop.eup %1838 }
 0x662   : > { %986 = vrot.lane.b32.xlu0 %v2112_v9, %s1923_s19  ;;  %v1154_v32 = vsel %vm503_vm2, %v1839_v31, 0.0 }
 0x663   : > { %1155 = vadd.xlane.f32.xlu1 %v1154_v32  ;;  %v1610_v32 = vld [vmem:[%s2302_s9] ss:$0 sm:$0xff] }
 0x674   : > { %1160 = vrot.lane.b32.xlu1 %v2112_v9, %s1924_s20  ;;  %s402_s20 = sand.u32 1, %s1902_s22  }
 0x678   : > { %1209 = vrot.lane.b32.xlu1 %v854_v59, %s1925_s26  ;;  %s1585_s26 = sshll.u32 %s402_s20, 3 }
 0x679   : > { %s404_s16 = scalar_lea.vmem [#allocation2], %s1585_s26 }
 0x67a   : > { %s1522_s17 = sshll.u32 %s404_s16, 4  ;;  %s2252_s17 = int_to_ptr.vmem [resolvable:$true] %s1522_s17 }
 0x67b   : > { %s1848_s26 = scalar_lea.vmem %s2252_s17, 128  ;;  %p1855_p0 = scmp.lt.s32.totalorder %s2252_s17, %s1853_s29 }
 0x67c   : > { %p1849_p11 = scmp.ne.s32.totalorder %s2252_s17, %s1848_s26  ;;  %p1856_p1 = scmp.lt.s32.totalorder %s1854_s1, %s1848_s26 }
 0x67e   : > { %p1850_p12 = pnand %p1849_p11, %p2032_p5  ;;  %p1857_p2 = por %p1856_p1, %p1855_p0 }
 0x680   : > { %p1851_p13 = pneg %p1850_p12 }
 0x682   : > { %p1858_p3 = pnand %p1857_p2, %p1851_p13 }
 0x6d9   : > { %v982_v33 = vpop.xlane.xlu0 %981 }
 0x6da   : > { %1840 = vrcp.f32 %v982_v33 }
 0x6dd   : > { %v987_v34 = vpop.permute.xlu0 %986 }
 0x6de   : > { %v992_v35 = vsel %vm642_vm7, %v987_v34, 0 }
 0x6df   : > { %1697 = vmatpush3.bf16.msra.mxu0 %v992_v35 }
 0x6e0   : > { %1713 = vmatprep.subr.bf16.mxu0 %v1912_v8 }
 0x6e4   : > { %v1841_v36 = vpop.eup %1840 }
 0x6e5   : > { %v984_v37 = vmul.f32 %v1841_v36, %v1837_v28 }
 0x6e7   : > { %v985_v38 = vpack.c.bf16 %v984_v37, %v984_v37 }
 0x6e9   : > { %1699 = vmatmul.mubr.msk.bf16.vlgmr.msra.gmra.mrb[4].mxu0 %vm503_vm2, %v985_v38 }
 0x6ea   : > { %1717 = vmatprep.mubr.msk.bf16.mxu0 %vm1913_vm1, %v1912_v8  ;;  %1714 = vmatpush3.bf16.msra.mxu0 %v1806_v45 }
 0x6eb   : > { %1715 = vmatprep.subr.bf16.mxu0 %v1912_v8 }
 0x6ee   : > { %1716 = vmatpush3.bf16.msra.mxu0 %v1807_v50 }
 0x6ef   : > { %1729 = vmatprep.subr.bf16.mxu0 %v1912_v8 }
 0x6f0   : > { %v1156_v40 = vpop.xlane.xlu1 %1155 }
 0x6f1   : > { %1842 = vrcp.f32 %v1156_v40 }
 0x6f4   : > { %v1161_v9 = vpop.permute.xlu1 %1160 }
 0x6f5   : > { %v1166_v41 = vsel %vm642_vm7, %v1161_v9, 0 }
 0x6f6   : > { %1708 = vmatpush3.bf16.msra.mxu1 %v1166_v41 }
 0x6f7   : > { %1721 = vmatprep.subr.bf16.mxu1 %v1912_v8 }
 0x6f8   : > { %v1210_v56 = vpop.permute.xlu1 %1209 }
 0x6f9   : > { %v1220_v58 = vsel %vm503_vm2, %v2151_v55, %v1210_v56 }
 0x6fb   : > { %v1843_v42 = vpop.eup %1842 }
 0x6fc   : > { %v1158_v43 = vmul.f32 %v1843_v42, %v1839_v31  ;;  %v1817_v31 = vld [vmem:[%s2303_s10 + $0x38] sm:$0xff]  }
 0x6fe   : > { %v1159_v44 = vpack.c.bf16 %v1158_v43, %v1158_v43  ;;  %v1614_v43 = vld [vmem:[%s2304_s11] ss:$0 sm:$0xff] }
 0x700   : > { %1710 = vmatmul.mubr.msk.bf16.vlgmr.msra.gmra.mrb[16].mxu1 %vm503_vm2, %v1159_v44 }
 0x701   : > { %1725 = vmatprep.mubr.msk.bf16.mxu1 %vm1913_vm1, %v1912_v8  ;;  %1722 = vmatpush3.bf16.msra.mxu1 %v1808_v14 }
 0x702   : > { %1723 = vmatprep.subr.bf16.mxu1 %v1912_v8 }
 0x7bc   : > { %v1028_v46 = vpop.f32.mrb[4].mxu0 }
 0x7bd   : > { %1213 = vrot.lane.b32.xlu0 %v1028_v46, %s1926_s15  ;;  %v1700_v47 = vpop.f32.mrb[5].mxu0  ;;  %s1624_s15 = sshll.u32 %s2015_s25, 7  ;;  %s1509_s25 = scalar_lea.sflag [#allocation3], %s402_s20 }
 0x7be   : > { %v1031_v48 = vpop.f32.mrb[6].mxu0  ;;  %s2250_s0 = scalar_lea.hbm %s2305_s12, %s1624_s15 }
 0x7bf   : > { %v1701_v49 = vpop.f32.mrb[7].mxu0 }
 0x7d3   : > { %v1202_v51 = vpop.f32.mrb[16].mxu1 }
 0x7d4   : > { %1217 = vrot.lane.b32.xlu1 %v1202_v51, %s1927_s18  ;;  %v1711_v52 = vpop.f32.mrb[17].mxu1 }
 0x7d5   : > { %v1205_v53 = vpop.f32.mrb[18].mxu1 }
 0x7d6   : > { %v1712_v54 = vpop.f32.mrb[19].mxu1 }
 0x82f   : > { %v1214_v57 = vpop.permute.xlu0 %1213 }
 0x830   : > { %v1222_v59 = vsel %vm1221_vm12, %v1220_v58, %v1214_v57 }
 0x846   : > { %v1218_v60 = vpop.permute.xlu1 %1217 }
 0x847   : > { %v1224_v61 = vsel %vm1223_vm13, %v1222_v59, %v1218_v60 }
 0x848   : > { %v1225_v62 = vpack.c.bf16 %v1224_v61, %v1224_v61 }
 0x84a   : > { %1718 = vmatmul.mubr.msk.bf16.vlgmr.msra.gmra.mrb[8].mxu0 %vm411_vm0, %v1225_v62 }
 0x84b   : > { %1745 = vmatprep.mubr.msk.bf16.mxu0 %vm1913_vm1, %v1912_v8  ;;  %1730 = vmatpush3.bf16.msra.mxu0 %v1810_v15 }
 0x84c   : > { %1731 = vmatprep.subr.bf16.mxu0 %v1912_v8 }
 0x84f   : > { %1732 = vmatpush3.bf16.msra.mxu0 %v1811_v16 }
 0x850   : > { %1733 = vmatprep.subr.bf16.mxu0 %v1912_v8 }
 0x853   : > { %1734 = vmatpush3.bf16.msra.mxu0 %v1812_v17 }
 0x854   : > { %1735 = vmatprep.subr.bf16.mxu0 %v1912_v8 }
 0x857   : > { %1736 = vmatpush3.bf16.msra.mxu0 %v1813_v29 }
 0x858   : > { %1737 = vmatprep.subr.bf16.mxu0 %v1912_v8 }
 0x85b   : > { %1738 = vmatpush3.bf16.msra.mxu0 %v1814_v20 }
 0x85c   : > { %1739 = vmatprep.subr.bf16.mxu0 %v1912_v8 }
 0x85f   : > { %1740 = vmatpush3.bf16.msra.mxu0 %v1815_v24 }
 0x860   : > { %1741 = vmatprep.subr.bf16.mxu0 %v1912_v8 }
 0x863   : > { %1742 = vmatpush3.bf16.msra.mxu0 %v1816_v30 }
 0x864   : > { %1743 = vmatprep.subr.bf16.mxu0 %v1912_v8 }
 0x867   : > { %1744 = vmatpush3.bf16.msra.mxu0 %v1817_v31 }
 0x91d   : > { %v1286_v1 = vpop.f32.mrb[8].mxu0 }
 0x91e   : > { %v1287_v2 = vadd.f32 %v1604_v63, %v1286_v1  ;;  %v1719_v3 = vpop.f32.mrb[9].mxu0 }
 0x91f   : > { %v1289_v4 = vpop.f32.mrb[10].mxu0 }
 0x920   : > { %v2187_v5 = vadd.f32 %v1287_v2, %v2047_v0  ;;  %v1720_v55 = vpop.f32.mrb[11].mxu0  ;;  %v1809_v0 = vld [vmem:[%s2301_s8 + $0x8] sm:$0xff]  }
 0x921   : > { %1724 = vmatpush3.bf16.msra.mxu1 %v1809_v0 }
 0x922   : > { %v1293_v6 = vsel %vm411_vm0, %v2187_v5, 0.0 }
 0x923   : > { %1294 = vadd.xlane.f32.xlu0 %v1293_v6 }
 0x9b0   : > { %v1295_v7 = vpop.xlane.xlu0 %1294 }
 0x9b1   : > { %v1296_v10 = vmul.f32 0.03125, %v1295_v7 }
 0x9b3   : > { %v1297_v11 = vsub.f32 %v2187_v5, %v1296_v10 }
 0x9b5   : > { %v1298_v12 = vmul.f32 %v1297_v11, %v1297_v11 }
 0x9b7   : > { %v1299_v13 = vsel %vm411_vm0, %v1298_v12, 0.0 }
 0x9b8   : > { %1300 = vadd.xlane.f32.xlu1 %v1299_v13 }
 0xa45   : > { %v1301_v18 = vpop.xlane.xlu1 %1300 }
 0xa46   : > { %v1302_v19 = vmul.f32 0.03125, %v1301_v18 }
 0xa48   : > { %v1303_v21 = vadd.f32 1e-05, %v1302_v19 }
 0xa4a   : > { %1844 = vrsqrt.f32 %v1303_v21 }
 0xa54   : > { %v1845_v22 = vpop.eup %1844 }
 0xa55   : > { %v1305_v39 = vmul.f32 %v1845_v22, %v1297_v11 }
 0xa57   : > { %v1313_v26 = vmul.f32 %v1608_v23, %v1305_v39 }
 0xa59   : > { %v1321_v27 = vadd.f32 %v1609_v25, %v1313_v26 }
 0xa5b   : > { %v1322_v28 = vpack.c.bf16 %v1321_v27, %v1321_v27 }
 0xa5d   : > { %1726 = vmatmul.mubr.msk.bf16.vlgmr.msra.gmra.mrb[20].mxu1 %vm411_vm0, %v1322_v28 }
 0xb30   : > { %v1383_v33 = vpop.f32.mrb[20].mxu1 }
 0xb31   : > { %v1384_v34 = vadd.f32 %v1610_v32, %v1383_v33  ;;  %v1727_v35 = vpop.f32.mrb[21].mxu1 }
 0xb32   : > { %v1386_v36 = vpop.f32.mrb[22].mxu1 }
 0xb33   : > { %v1390_v37 = vmul.f32 0.70710677, %v1384_v34  ;;  %v1728_v38 = vpop.f32.mrb[23].mxu1  ;;  %v1389_v8 = vmul.f32 0.5, %v1384_v34 }
 0xb35   : > { %1846 = verf.f32 %v1390_v37 }
 0xb3f   : > { %v1847_v40 = vpop.eup %1846 }
 0xb40   : > { %v1392_v9 = vadd.f32 1.0, %v1847_v40 }
 0xb42   : > { %v1393_v41 = vmul.f32 %v1392_v9, %v1389_v8 }
 0xb44   : > { %v1394_v42 = vpack.c.bf16 %v1393_v41, %v1393_v41 }
 0xb46   : > { %1746 = vmatmul.mubr.bf16.vlgmr.msra.gmra.mrb[12].mxu0 %v1394_v42 }
 0xc19   : > { %v1500_v44 = vpop.f32.mrb[12].mxu0 }
 0xc1a   : > { %v1501_v45 = vadd.f32 %v1614_v43, %v1500_v44  ;;  %v1747_v46 = vpop.f32.mrb[13].mxu0 }
 0xc1b   : > { %v1503_v47 = vpop.f32.mrb[14].mxu0 }
 0xc1c   : > { %v1506_v48 = vadd.f32 %v1501_v45, %v2187_v5  ;;  %v1748_v49 = vpop.f32.mrb[15].mxu0 }
 0xc1e   : > { %1507 = vst.msk [vmem:[%s404_s16] sm:$0xff] %vm411_vm0, %v1506_v48 }
 0xc1f   : > { %1861 = shalt.err (!%p1858_p3)
}
 0xc20   : > { %s1862_s20 = scalar_lea.hbm %s2250_s0, 128  ;;  %s1866_s18 = scalar_lea.hbm %s2305_s12, 256 }
 0xc21   : > { %p1863_p4 = scmp.ne.s32.totalorder %s2250_s0, %s1862_s20  ;;  %p1867_p9 = scmp.lt.u32.totalorder %s2250_s0, %s2305_s12 }
 0xc22   : > { %p1868_p10 = scmp.lt.u32.totalorder %s1866_s18, %s1862_s20  ;;  %p1870_p12 = scmp.lt.u32.totalorder %s1862_s20, %s2250_s0 }
 0xc23   : > { %p1864_p7 = pnand %p1863_p4, %p2032_p5 }
 0xc24   : > { %p1869_p11 = por %p1868_p10, %p1867_p9 }
 0xc25   : > { %p1865_p8 = pneg %p1864_p7 }
 0xc26   : > { %p1871_p13 = por %p1870_p12, %p1869_p11 }
 0xc28   : > { %p1872_p0 = pnand %p1871_p13, %p1865_p8 }
 0xc2a   : > { %1875 = shalt.err (!%p1872_p0)
}
 0xc2b   : > { %1749 = dma.vmem_to_hbm [thread:$0]  (%p2032_p5), %s2252_s17, 128, %s2250_s0, %s1509_s25  }
 0xc2c PF: > { %p1755_p1 = scmp.ge.s32.totalorder %s1910_s24, 2  ;;  %s1534_s1 = sand.u32 1, %s1898_s21  }
 0xc2d   : > { %s1535_s26 = scalar_lea.sflag [#allocation3], %s1534_s1 }
 0xc2e   : > { %p1752_p2 = pnand %p1755_p1, %p2036_p6 }
 0xc30   : > { %1893 = dma.done.wait (!%p1752_p2), %s1535_s26, 128  }
 0xc31   : > { %1895 = vsyncadd (!%p1752_p2), %s1535_s26, 4294967168  ;;  %p22_p3 = scmp.ge.s32.totalorder %s2019_s27, 4   ;;  %s2312_s21 = smov %s1902_s22 }
 0xc32   : > { %s2313_s22 = smov %s1906_s23  ;;  %s2314_s23 = smov %s2030_s30 }
 0xc33   : > { %s2315_s24 = smov %s2019_s27  ;;  %24 = sbr.rel (!%p22_p3) target bundleno = 6 (0x6), region = 103 }
 0xc3a   :  { %1540 = vsyncpa [#allocation3], 1 }
 0xc3b   :  { %1542 = vsyncpa [#allocation3 + $0x1], 1 }

</bundles_post_ra>
